<compile_context>
chip_gen: v6e
topology: v6e:2x2x1
jax: 0.10.0
libtpu: 0.0.40
codegen_flags: <defaults>
</compile_context>

<pallas_src>
import jax
import jax.numpy as jnp
import numpy as np
from jax.experimental import pallas as pl
from jax.experimental.pallas import tpu as pltpu


# --------------------------------------------------------------------------
# Fused LeNet kernel (one batch tile per grid step)
# --------------------------------------------------------------------------
def _lenet_kernel(x_ref, w1t_ref, b1_ref, w2t_ref, b2_ref,
                  wf1_ref, bf1_ref, wf2_ref, bf2_ref, wf3_ref, bf3_ref,
                  out_ref, c1_scr, p1_scr, c2_scr):
    tb = x_ref.shape[0]
    f32 = jnp.float32

    # ---- conv1 + bias + ReLU: 5 Toeplitz matmuls -> (tb*24, 144), cols=(c,j)
    lhs = x_ref[:, 0:24, :].reshape(tb * 24, 28)
    acc1 = jnp.dot(lhs, w1t_ref[0], preferred_element_type=f32)
    for kh in range(1, 5):
        lhs = x_ref[:, kh:kh + 24, :].reshape(tb * 24, 28)
        acc1 = acc1 + jnp.dot(lhs, w1t_ref[kh], preferred_element_type=f32)
    c1_scr[...] = jnp.maximum(acc1 + b1_ref[...], 0.0).reshape(tb, 24, 144)

    # ---- maxpool1 2x2: row pairs maxed here, column pair-max via 1-lane
    #      shift; column decimation is folded into w2t (odd cols get 0 weight).
    for r in range(12):
        rowmax = jnp.maximum(c1_scr[:, 2 * r, :], c1_scr[:, 2 * r + 1, :])
        p1_scr[:, r, :] = jnp.maximum(rowmax[:, 0:143], rowmax[:, 1:144])

    # ---- conv2 + bias + ReLU: 5 Toeplitz matmuls -> (tb*8, 128), cols=(co,j2)
    lhs = p1_scr[:, 0:8, :].reshape(tb * 8, 143)
    acc2 = jnp.dot(lhs, w2t_ref[0], preferred_element_type=f32)
    for kh in range(1, 5):
        lhs = p1_scr[:, kh:kh + 8, :].reshape(tb * 8, 143)
        acc2 = acc2 + jnp.dot(lhs, w2t_ref[kh], preferred_element_type=f32)
    c2_scr[...] = jnp.maximum(acc2 + b2_ref[...], 0.0).reshape(tb, 8, 128)

    # ---- maxpool2 2x2 folded into fc1 (decimation + NCHW-flatten in wf1)
    rowmax = jnp.maximum(c2_scr[:, 0, :], c2_scr[:, 1, :])
    pooled = jnp.maximum(rowmax[:, 0:127], rowmax[:, 1:128])
    h = jnp.dot(pooled, wf1_ref[0], preferred_element_type=f32)
    for r in range(1, 4):
        rowmax = jnp.maximum(c2_scr[:, 2 * r, :], c2_scr[:, 2 * r + 1, :])
        pooled = jnp.maximum(rowmax[:, 0:127], rowmax[:, 1:128])
        h = h + jnp.dot(pooled, wf1_ref[r], preferred_element_type=f32)
    h = jnp.maximum(h + bf1_ref[...], 0.0)                          # fc1 + ReLU

    # ---- fc2 + ReLU, fc3
    h = jnp.maximum(
        jnp.dot(h, wf2_ref[...], preferred_element_type=f32) + bf2_ref[...], 0.0)
    out_ref[:, 0, :] = (
        jnp.dot(h, wf3_ref[...], preferred_element_type=f32) + bf3_ref[...])


# --------------------------------------------------------------------------
# Weight pre-transforms (pure jnp; fold conv Toeplitz, pool decimation and
# the NCHW flatten permutation into the weights once per call)
# --------------------------------------------------------------------------
def _prepare_weights(p):
    f32 = jnp.float32
    hp = jax.lax.Precision.HIGHEST

    c1w = p["conv1_w"].astype(f32)[:, 0]           # (6, 5, 5)  [c, kh, kw]
    c2w = p["conv2_w"].astype(f32)                 # (16, 6, 5, 5) [o, c, kh, kw]

    # conv1 Toeplitz-over-width: W1t[kh, w, c*24 + j] = c1w[c, kh, w - j]
    P = np.zeros((5, 28, 24), np.float32)          # P[kw, w, j] = [w == j + kw]
    for kw in range(5):
        for j in range(24):
            P[kw, j + kw, j] = 1.0
    w1t = jnp.einsum("chk,kwj->hwcj", c1w, jnp.asarray(P),
                     precision=hp).reshape(5, 28, 144)
    b1r = jnp.repeat(p["conv1_b"].astype(f32), 24).reshape(1, 144)

    # conv2 Toeplitz with pool1 column decimation folded in:
    # W2t[kh, c*24 + 2*jp, o*8 + j2] = c2w[o, c, kh, jp - j2]; odd rows = 0.
    R = np.zeros((6, 5, 143, 8), np.float32)
    for c in range(6):
        for kw in range(5):
            for j2 in range(8):
                R[c, kw, c * 24 + 2 * (j2 + kw), j2] = 1.0
    w2t = jnp.einsum("ochw,cwKj->hKoj", c2w, jnp.asarray(R),
                     precision=hp).reshape(5, 143, 128)
    b2r = jnp.repeat(p["conv2_b"].astype(f32), 8).reshape(1, 128)

    # fc1 with pool2 column decimation + PyTorch NCHW flatten folded in:
    # Wf1[i3, o*8 + 2*j3, n] = fc1_w[n, o*16 + i3*4 + j3]; odd rows = 0.
    T = np.zeros((4, 127, 256), np.float32)
    for i3 in range(4):
        for o in range(16):
            for j3 in range(4):
                T[i3, o * 8 + 2 * j3, o * 16 + i3 * 4 + j3] = 1.0
    wf1 = jnp.einsum("iKm,nm->iKn", jnp.asarray(T), p["fc1_w"].astype(f32),
                     precision=hp)                                  # (4,127,120)
    bf1 = p["fc1_b"].astype(f32).reshape(1, 120)

    wf2 = p["fc2_w"].astype(f32).T                 # (120, 84)
    bf2 = p["fc2_b"].astype(f32).reshape(1, 84)
    wf3 = p["fc3_w"].astype(f32).T                 # (84, 10)
    bf3 = p["fc3_b"].astype(f32).reshape(1, 10)
    return w1t, b1r, w2t, b2r, wf1, bf1, wf2, bf2, wf3, bf3


def _choose_batch_tile(batch):
    # Prefer >= 2 grid blocks (v7x has 2 TensorCores); cap the tile at 8 images
    # so per-step VMEM stays in the hundreds of KB on every chip generation.
    for tb in (8, 4, 2, 1):
        if batch % tb == 0 and batch // tb >= 2:
            return tb
    return batch


# --------------------------------------------------------------------------
# Forward pass
# --------------------------------------------------------------------------
def net_forward(x, params, *, batch_tile=None):
    """Forward pass of Net. x: (B, 1, 28, 28) float32 -> (B, 10) float32."""
    B = x.shape[0]
    assert x.shape[1:] == (1, 28, 28), "Net requires 1x28x28 inputs"
    tb = _choose_batch_tile(B) if batch_tile is None else batch_tile
    assert B % tb == 0, "batch_tile must divide the batch size"

    x3 = x.reshape(B, 28, 28).astype(jnp.float32)
    (w1t, b1r, w2t, b2r, wf1, bf1, wf2, bf2, wf3, bf3) = _prepare_weights(params)

    const2 = lambda i: (0, 0)
    const3 = lambda i: (0, 0, 0)

    out = pl.pallas_call(
        _lenet_kernel,
        out_shape=jax.ShapeDtypeStruct((B, 1, 10), jnp.float32),
        grid=(B // tb,),
        in_specs=[
            pl.BlockSpec((tb, 28, 28), lambda i: (i, 0, 0)),   # images
            pl.BlockSpec((5, 28, 144), const3),                # conv1 Toeplitz
            pl.BlockSpec((1, 144), const2),                    # conv1 bias row
            pl.BlockSpec((5, 143, 128), const3),               # conv2 Toeplitz
            pl.BlockSpec((1, 128), const2),                    # conv2 bias row
            pl.BlockSpec((4, 127, 120), const3),               # fc1 (pool folded)
            pl.BlockSpec((1, 120), const2),                    # fc1 bias
            pl.BlockSpec((120, 84), const2),                   # fc2 weight
            pl.BlockSpec((1, 84), const2),                     # fc2 bias
            pl.BlockSpec((84, 10), const2),                    # fc3 weight
            pl.BlockSpec((1, 10), const2),                     # fc3 bias
        ],
        out_specs=pl.BlockSpec((tb, 1, 10), lambda i: (i, 0, 0)),
        scratch_shapes=[
            pltpu.VMEM((tb, 24, 144), jnp.float32),   # conv1 output
            pltpu.VMEM((tb, 12, 143), jnp.float32),   # pooled1 (odd cols junk)
            pltpu.VMEM((tb, 8, 128), jnp.float32),    # conv2 output
        ],
        compiler_params=pltpu.CompilerParams(
            dimension_semantics=("parallel",),
            vmem_limit_bytes=32 * 1024 * 1024,
        ),
    )(x3, w1t, b1r, w2t, b2r, wf1, bf1, wf2, bf2, wf3, bf3)
    return out.reshape(B, 10)


# --------------------------------------------------------------------------
# Parameters (deterministic, PyTorch-style shapes/init)
# --------------------------------------------------------------------------
def init_params(key):
    ks = jax.random.split(key, 10)

    def u(k, shape, fan_in):
        bound = 1.0 / np.sqrt(fan_in)
        return jax.random.uniform(k, shape, jnp.float32, -bound, bound)

    return {
        "conv1_w": u(ks[0], (6, 1, 5, 5), 1 * 5 * 5),
        "conv1_b": u(ks[1], (6,), 1 * 5 * 5),
        "conv2_w": u(ks[2], (16, 6, 5, 5), 6 * 5 * 5),
        "conv2_b": u(ks[3], (16,), 6 * 5 * 5),
        "fc1_w": u(ks[4], (120, 16 * 4 * 4), 16 * 4 * 4),
        "fc1_b": u(ks[5], (120,), 16 * 4 * 4),
        "fc2_w": u(ks[6], (84, 120), 120),
        "fc2_b": u(ks[7], (84,), 120),
        "fc3_w": u(ks[8], (10, 84), 84),
        "fc3_b": u(ks[9], (10,), 84),
    }


# Pure-JAX reference for a numerical sanity check.
def reference_forward(x, p):
    def conv(x, w, b):
        y = jax.lax.conv_general_dilated(
            x, w, (1, 1), "VALID", dimension_numbers=("NCHW", "OIHW", "NCHW"))
        return jnp.maximum(y + b[None, :, None, None], 0.0)

    def pool(x):
        return jax.lax.reduce_window(
            x, -jnp.inf, jax.lax.max, (1, 1, 2, 2), (1, 1, 2, 2), "VALID")

    y = pool(conv(x, p["conv1_w"], p["conv1_b"]))
    y = pool(conv(y, p["conv2_w"], p["conv2_b"]))
    y = y.reshape(y.shape[0], -1)
    y = jnp.maximum(y @ p["fc1_w"].T + p["fc1_b"], 0.0)
    y = jnp.maximum(y @ p["fc2_w"].T + p["fc2_b"], 0.0)
    return y @ p["fc3_w"].T + p["fc3_b"]


if __name__ == "__main__":
    key = jax.random.PRNGKey(0)
    pkey, xkey = jax.random.split(key)
    params = init_params(pkey)
    # 28x28 input is required by the module: fc1 expects 16*4*4 features.
    x = jax.random.normal(xkey, (2, 1, 28, 28), jnp.float32)

    out = jax.block_until_ready(jax.jit(net_forward)(x, params))
    assert out.shape == (2, 10) and out.dtype == jnp.float32

    ref = jax.block_until_ready(reference_forward(x, params))
    np.testing.assert_allclose(np.asarray(out), np.asarray(ref), rtol=2e-2, atol=2e-2)

    print("KERNEL_OK")
</pallas_src>

<mosaic_0001>
module attributes {stable_mosaic.version = 11 : i64} {
  func.func @_lenet_kernel(%arg0: i32, %arg1: memref<1x28x28xf32, #tpu.memory_space<vmem>>, %arg2: memref<5x28x144xf32, #tpu.memory_space<vmem>>, %arg3: memref<1x144xf32, #tpu.memory_space<vmem>>, %arg4: memref<5x143x128xf32, #tpu.memory_space<vmem>>, %arg5: memref<1x128xf32, #tpu.memory_space<vmem>>, %arg6: memref<4x127x120xf32, #tpu.memory_space<vmem>>, %arg7: memref<1x120xf32, #tpu.memory_space<vmem>>, %arg8: memref<120x84xf32, #tpu.memory_space<vmem>>, %arg9: memref<1x84xf32, #tpu.memory_space<vmem>>, %arg10: memref<84x10xf32, #tpu.memory_space<vmem>>, %arg11: memref<1x10xf32, #tpu.memory_space<vmem>>, %arg12: memref<1x1x10xf32, #tpu.memory_space<vmem>>, %arg13: memref<1x24x144xf32, #tpu.memory_space<vmem>>, %arg14: memref<1x12x143xf32, #tpu.memory_space<vmem>>, %arg15: memref<1x8x128xf32, #tpu.memory_space<vmem>>) attributes {dimension_semantics = [#tpu.dimension_semantics<parallel>], iteration_bounds = array<i64: 2>, scalar_prefetch = 0 : i64, scratch_operands = 3 : i64, tpu.core_type = #tpu.core_type<tc>, window_params = [{transform_indices = @transform_0, window_bounds = array<i64: 1, 28, 28>}, {pipeline_mode = #tpu.pipeline_mode<synchronous>, transform_indices = @transform_1, window_bounds = array<i64: 5, 28, 144>}, {pipeline_mode = #tpu.pipeline_mode<synchronous>, transform_indices = @transform_2, window_bounds = array<i64: 1, 144>}, {pipeline_mode = #tpu.pipeline_mode<synchronous>, transform_indices = @transform_3, window_bounds = array<i64: 5, 143, 128>}, {pipeline_mode = #tpu.pipeline_mode<synchronous>, transform_indices = @transform_4, window_bounds = array<i64: 1, 128>}, {pipeline_mode = #tpu.pipeline_mode<synchronous>, transform_indices = @transform_5, window_bounds = array<i64: 4, 127, 120>}, {pipeline_mode = #tpu.pipeline_mode<synchronous>, transform_indices = @transform_6, window_bounds = array<i64: 1, 120>}, {pipeline_mode = #tpu.pipeline_mode<synchronous>, transform_indices = @transform_7, window_bounds = array<i64: 120, 84>}, {pipeline_mode = #tpu.pipeline_mode<synchronous>, transform_indices = @transform_8, window_bounds = array<i64: 1, 84>}, {pipeline_mode = #tpu.pipeline_mode<synchronous>, transform_indices = @transform_9, window_bounds = array<i64: 84, 10>}, {pipeline_mode = #tpu.pipeline_mode<synchronous>, transform_indices = @transform_10, window_bounds = array<i64: 1, 10>}, {transform_indices = @transform_11, window_bounds = array<i64: 1, 1, 10>}]} {
    %c0 = arith.constant 0 : index
    %c0_0 = arith.constant 0 : index
    %c0_1 = arith.constant 0 : index
    %0 = vector.load %arg1[%c0, %c0_0, %c0_1] : memref<1x28x28xf32, #tpu.memory_space<vmem>>, vector<1x24x28xf32>
    %1 = vector.shape_cast %0 : vector<1x24x28xf32> to vector<24x28xf32>
    %c0_2 = arith.constant 0 : index
    %c0_3 = arith.constant 0 : index
    %c0_4 = arith.constant 0 : index
    %2 = vector.load %arg2[%c0_2, %c0_3, %c0_4] : memref<5x28x144xf32, #tpu.memory_space<vmem>>, vector<1x28x144xf32>
    %3 = vector.shape_cast %2 : vector<1x28x144xf32> to vector<28x144xf32>
    %cst = arith.constant dense<0.000000e+00> : vector<24x144xf32>
    %4 = tpu.matmul %1, %3, %cst {dimension_numbers = #tpu.dot_dimension_numbers<[1], [0], [0], [1], [0, 0, 1, 1], [], []>} : vector<24x28xf32>, vector<28x144xf32>, vector<24x144xf32> -> vector<24x144xf32>
    %c0_5 = arith.constant 0 : index
    %c1 = arith.constant 1 : index
    %c0_6 = arith.constant 0 : index
    %5 = vector.load %arg1[%c0_5, %c1, %c0_6] : memref<1x28x28xf32, #tpu.memory_space<vmem>>, vector<1x24x28xf32>
    %6 = vector.shape_cast %5 : vector<1x24x28xf32> to vector<24x28xf32>
    %c1_7 = arith.constant 1 : index
    %c0_8 = arith.constant 0 : index
    %c0_9 = arith.constant 0 : index
    %7 = vector.load %arg2[%c1_7, %c0_8, %c0_9] : memref<5x28x144xf32, #tpu.memory_space<vmem>>, vector<1x28x144xf32>
    %8 = vector.shape_cast %7 : vector<1x28x144xf32> to vector<28x144xf32>
    %cst_10 = arith.constant dense<0.000000e+00> : vector<24x144xf32>
    %9 = tpu.matmul %6, %8, %cst_10 {dimension_numbers = #tpu.dot_dimension_numbers<[1], [0], [0], [1], [0, 0, 1, 1], [], []>} : vector<24x28xf32>, vector<28x144xf32>, vector<24x144xf32> -> vector<24x144xf32>
    %10 = arith.addf %4, %9 : vector<24x144xf32>
    %c0_11 = arith.constant 0 : index
    %c2 = arith.constant 2 : index
    %c0_12 = arith.constant 0 : index
    %11 = vector.load %arg1[%c0_11, %c2, %c0_12] : memref<1x28x28xf32, #tpu.memory_space<vmem>>, vector<1x24x28xf32>
    %12 = vector.shape_cast %11 : vector<1x24x28xf32> to vector<24x28xf32>
    %c2_13 = arith.constant 2 : index
    %c0_14 = arith.constant 0 : index
    %c0_15 = arith.constant 0 : index
    %13 = vector.load %arg2[%c2_13, %c0_14, %c0_15] : memref<5x28x144xf32, #tpu.memory_space<vmem>>, vector<1x28x144xf32>
    %14 = vector.shape_cast %13 : vector<1x28x144xf32> to vector<28x144xf32>
    %cst_16 = arith.constant dense<0.000000e+00> : vector<24x144xf32>
    %15 = tpu.matmul %12, %14, %cst_16 {dimension_numbers = #tpu.dot_dimension_numbers<[1], [0], [0], [1], [0, 0, 1, 1], [], []>} : vector<24x28xf32>, vector<28x144xf32>, vector<24x144xf32> -> vector<24x144xf32>
    %16 = arith.addf %10, %15 : vector<24x144xf32>
    %c0_17 = arith.constant 0 : index
    %c3 = arith.constant 3 : index
    %c0_18 = arith.constant 0 : index
    %17 = vector.load %arg1[%c0_17, %c3, %c0_18] : memref<1x28x28xf32, #tpu.memory_space<vmem>>, vector<1x24x28xf32>
    %18 = vector.shape_cast %17 : vector<1x24x28xf32> to vector<24x28xf32>
    %c3_19 = arith.constant 3 : index
    %c0_20 = arith.constant 0 : index
    %c0_21 = arith.constant 0 : index
    %19 = vector.load %arg2[%c3_19, %c0_20, %c0_21] : memref<5x28x144xf32, #tpu.memory_space<vmem>>, vector<1x28x144xf32>
    %20 = vector.shape_cast %19 : vector<1x28x144xf32> to vector<28x144xf32>
    %cst_22 = arith.constant dense<0.000000e+00> : vector<24x144xf32>
    %21 = tpu.matmul %18, %20, %cst_22 {dimension_numbers = #tpu.dot_dimension_numbers<[1], [0], [0], [1], [0, 0, 1, 1], [], []>} : vector<24x28xf32>, vector<28x144xf32>, vector<24x144xf32> -> vector<24x144xf32>
    %22 = arith.addf %16, %21 : vector<24x144xf32>
    %c0_23 = arith.constant 0 : index
    %c4 = arith.constant 4 : index
    %c0_24 = arith.constant 0 : index
    %23 = vector.load %arg1[%c0_23, %c4, %c0_24] : memref<1x28x28xf32, #tpu.memory_space<vmem>>, vector<1x24x28xf32>
    %24 = vector.shape_cast %23 : vector<1x24x28xf32> to vector<24x28xf32>
    %c4_25 = arith.constant 4 : index
    %c0_26 = arith.constant 0 : index
    %c0_27 = arith.constant 0 : index
    %25 = vector.load %arg2[%c4_25, %c0_26, %c0_27] : memref<5x28x144xf32, #tpu.memory_space<vmem>>, vector<1x28x144xf32>
    %26 = vector.shape_cast %25 : vector<1x28x144xf32> to vector<28x144xf32>
    %cst_28 = arith.constant dense<0.000000e+00> : vector<24x144xf32>
    %27 = tpu.matmul %24, %26, %cst_28 {dimension_numbers = #tpu.dot_dimension_numbers<[1], [0], [0], [1], [0, 0, 1, 1], [], []>} : vector<24x28xf32>, vector<28x144xf32>, vector<24x144xf32> -> vector<24x144xf32>
    %28 = arith.addf %22, %27 : vector<24x144xf32>
    %c0_29 = arith.constant 0 : index
    %c0_30 = arith.constant 0 : index
    %29 = vector.load %arg3[%c0_29, %c0_30] : memref<1x144xf32, #tpu.memory_space<vmem>>, vector<1x144xf32>
    %30 = vector.broadcast %29 : vector<1x144xf32> to vector<24x144xf32>
    %31 = arith.addf %28, %30 : vector<24x144xf32>
    %cst_31 = arith.constant 0.000000e+00 : f32
    %32 = vector.broadcast %cst_31 : f32 to vector<24x144xf32>
    %33 = arith.maximumf %31, %32 : vector<24x144xf32>
    %34 = vector.shape_cast %33 : vector<24x144xf32> to vector<1x24x144xf32>
    %c0_32 = arith.constant 0 : index
    %c0_33 = arith.constant 0 : index
    %c0_34 = arith.constant 0 : index
    %35 = vector.load %arg13[%c0_32, %c0_33, %c0_34] : memref<1x24x144xf32, #tpu.memory_space<vmem>>, vector<1x24x144xf32>
    tpu.vector_store %arg13[%c0_32, %c0_33, %c0_34], %34 {strides = array<i32>} : memref<1x24x144xf32, #tpu.memory_space<vmem>>, vector<1x24x144xf32>,
    %c0_35 = arith.constant 0 : index
    %c0_36 = arith.constant 0 : index
    %c0_37 = arith.constant 0 : index
    %36 = vector.load %arg13[%c0_35, %c0_36, %c0_37] : memref<1x24x144xf32, #tpu.memory_space<vmem>>, vector<1x1x144xf32>
    %37 = vector.shape_cast %36 : vector<1x1x144xf32> to vector<1x144xf32>
    %c0_38 = arith.constant 0 : index
    %c1_39 = arith.constant 1 : index
    %c0_40 = arith.constant 0 : index
    %38 = vector.load %arg13[%c0_38, %c1_39, %c0_40] : memref<1x24x144xf32, #tpu.memory_space<vmem>>, vector<1x1x144xf32>
    %39 = vector.shape_cast %38 : vector<1x1x144xf32> to vector<1x144xf32>
    %40 = arith.maximumf %37, %39 : vector<1x144xf32>
    %41 = vector.extract_strided_slice %40 {offsets = [0, 0], sizes = [1, 143], strides = [1, 1]} : vector<1x144xf32> to vector<1x143xf32>
    %42 = vector.extract_strided_slice %40 {offsets = [0, 1], sizes = [1, 143], strides = [1, 1]} : vector<1x144xf32> to vector<1x143xf32>
    %43 = arith.maximumf %41, %42 : vector<1x143xf32>
    %c0_41 = arith.constant 0 : index
    %c0_42 = arith.constant 0 : index
    %c0_43 = arith.constant 0 : index
    %44 = vector.load %arg14[%c0_41, %c0_42, %c0_43] : memref<1x12x143xf32, #tpu.memory_space<vmem>>, vector<1x1x143xf32>
    %45 = vector.shape_cast %44 : vector<1x1x143xf32> to vector<1x143xf32>
    %46 = vector.shape_cast %43 : vector<1x143xf32> to vector<1x1x143xf32>
    tpu.vector_store %arg14[%c0_41, %c0_42, %c0_43], %46 {strides = array<i32>} : memref<1x12x143xf32, #tpu.memory_space<vmem>>, vector<1x1x143xf32>,
    %c0_44 = arith.constant 0 : index
    %c2_45 = arith.constant 2 : index
    %c0_46 = arith.constant 0 : index
    %47 = vector.load %arg13[%c0_44, %c2_45, %c0_46] : memref<1x24x144xf32, #tpu.memory_space<vmem>>, vector<1x1x144xf32>
    %48 = vector.shape_cast %47 : vector<1x1x144xf32> to vector<1x144xf32>
    %c0_47 = arith.constant 0 : index
    %c3_48 = arith.constant 3 : index
    %c0_49 = arith.constant 0 : index
    %49 = vector.load %arg13[%c0_47, %c3_48, %c0_49] : memref<1x24x144xf32, #tpu.memory_space<vmem>>, vector<1x1x144xf32>
    %50 = vector.shape_cast %49 : vector<1x1x144xf32> to vector<1x144xf32>
    %51 = arith.maximumf %48, %50 : vector<1x144xf32>
    %52 = vector.extract_strided_slice %51 {offsets = [0, 0], sizes = [1, 143], strides = [1, 1]} : vector<1x144xf32> to vector<1x143xf32>
    %53 = vector.extract_strided_slice %51 {offsets = [0, 1], sizes = [1, 143], strides = [1, 1]} : vector<1x144xf32> to vector<1x143xf32>
    %54 = arith.maximumf %52, %53 : vector<1x143xf32>
    %c0_50 = arith.constant 0 : index
    %c1_51 = arith.constant 1 : index
    %c0_52 = arith.constant 0 : index
    %55 = vector.load %arg14[%c0_50, %c1_51, %c0_52] : memref<1x12x143xf32, #tpu.memory_space<vmem>>, vector<1x1x143xf32>
    %56 = vector.shape_cast %55 : vector<1x1x143xf32> to vector<1x143xf32>
    %57 = vector.shape_cast %54 : vector<1x143xf32> to vector<1x1x143xf32>
    tpu.vector_store %arg14[%c0_50, %c1_51, %c0_52], %57 {strides = array<i32>} : memref<1x12x143xf32, #tpu.memory_space<vmem>>, vector<1x1x143xf32>,
    %c0_53 = arith.constant 0 : index
    %c4_54 = arith.constant 4 : index
    %c0_55 = arith.constant 0 : index
    %58 = vector.load %arg13[%c0_53, %c4_54, %c0_55] : memref<1x24x144xf32, #tpu.memory_space<vmem>>, vector<1x1x144xf32>
    %59 = vector.shape_cast %58 : vector<1x1x144xf32> to vector<1x144xf32>
    %c0_56 = arith.constant 0 : index
    %c5 = arith.constant 5 : index
    %c0_57 = arith.constant 0 : index
    %60 = vector.load %arg13[%c0_56, %c5, %c0_57] : memref<1x24x144xf32, #tpu.memory_space<vmem>>, vector<1x1x144xf32>
    %61 = vector.shape_cast %60 : vector<1x1x144xf32> to vector<1x144xf32>
    %62 = arith.maximumf %59, %61 : vector<1x144xf32>
    %63 = vector.extract_strided_slice %62 {offsets = [0, 0], sizes = [1, 143], strides = [1, 1]} : vector<1x144xf32> to vector<1x143xf32>
    %64 = vector.extract_strided_slice %62 {offsets = [0, 1], sizes = [1, 143], strides = [1, 1]} : vector<1x144xf32> to vector<1x143xf32>
    %65 = arith.maximumf %63, %64 : vector<1x143xf32>
    %c0_58 = arith.constant 0 : index
    %c2_59 = arith.constant 2 : index
    %c0_60 = arith.constant 0 : index
    %66 = vector.load %arg14[%c0_58, %c2_59, %c0_60] : memref<1x12x143xf32, #tpu.memory_space<vmem>>, vector<1x1x143xf32>
    %67 = vector.shape_cast %66 : vector<1x1x143xf32> to vector<1x143xf32>
    %68 = vector.shape_cast %65 : vector<1x143xf32> to vector<1x1x143xf32>
    tpu.vector_store %arg14[%c0_58, %c2_59, %c0_60], %68 {strides = array<i32>} : memref<1x12x143xf32, #tpu.memory_space<vmem>>, vector<1x1x143xf32>,
    %c0_61 = arith.constant 0 : index
    %c6 = arith.constant 6 : index
    %c0_62 = arith.constant 0 : index
    %69 = vector.load %arg13[%c0_61, %c6, %c0_62] : memref<1x24x144xf32, #tpu.memory_space<vmem>>, vector<1x1x144xf32>
    %70 = vector.shape_cast %69 : vector<1x1x144xf32> to vector<1x144xf32>
    %c0_63 = arith.constant 0 : index
    %c7 = arith.constant 7 : index
    %c0_64 = arith.constant 0 : index
    %71 = vector.load %arg13[%c0_63, %c7, %c0_64] : memref<1x24x144xf32, #tpu.memory_space<vmem>>, vector<1x1x144xf32>
    %72 = vector.shape_cast %71 : vector<1x1x144xf32> to vector<1x144xf32>
    %73 = arith.maximumf %70, %72 : vector<1x144xf32>
    %74 = vector.extract_strided_slice %73 {offsets = [0, 0], sizes = [1, 143], strides = [1, 1]} : vector<1x144xf32> to vector<1x143xf32>
    %75 = vector.extract_strided_slice %73 {offsets = [0, 1], sizes = [1, 143], strides = [1, 1]} : vector<1x144xf32> to vector<1x143xf32>
    %76 = arith.maximumf %74, %75 : vector<1x143xf32>
    %c0_65 = arith.constant 0 : index
    %c3_66 = arith.constant 3 : index
    %c0_67 = arith.constant 0 : index
    %77 = vector.load %arg14[%c0_65, %c3_66, %c0_67] : memref<1x12x143xf32, #tpu.memory_space<vmem>>, vector<1x1x143xf32>
    %78 = vector.shape_cast %77 : vector<1x1x143xf32> to vector<1x143xf32>
    %79 = vector.shape_cast %76 : vector<1x143xf32> to vector<1x1x143xf32>
    tpu.vector_store %arg14[%c0_65, %c3_66, %c0_67], %79 {strides = array<i32>} : memref<1x12x143xf32, #tpu.memory_space<vmem>>, vector<1x1x143xf32>,
    %c0_68 = arith.constant 0 : index
    %c8 = arith.constant 8 : index
    %c0_69 = arith.constant 0 : index
    %80 = vector.load %arg13[%c0_68, %c8, %c0_69] : memref<1x24x144xf32, #tpu.memory_space<vmem>>, vector<1x1x144xf32>
    %81 = vector.shape_cast %80 : vector<1x1x144xf32> to vector<1x144xf32>
    %c0_70 = arith.constant 0 : index
    %c9 = arith.constant 9 : index
    %c0_71 = arith.constant 0 : index
    %82 = vector.load %arg13[%c0_70, %c9, %c0_71] : memref<1x24x144xf32, #tpu.memory_space<vmem>>, vector<1x1x144xf32>
    %83 = vector.shape_cast %82 : vector<1x1x144xf32> to vector<1x144xf32>
    %84 = arith.maximumf %81, %83 : vector<1x144xf32>
    %85 = vector.extract_strided_slice %84 {offsets = [0, 0], sizes = [1, 143], strides = [1, 1]} : vector<1x144xf32> to vector<1x143xf32>
    %86 = vector.extract_strided_slice %84 {offsets = [0, 1], sizes = [1, 143], strides = [1, 1]} : vector<1x144xf32> to vector<1x143xf32>
    %87 = arith.maximumf %85, %86 : vector<1x143xf32>
    %c0_72 = arith.constant 0 : index
    %c4_73 = arith.constant 4 : index
    %c0_74 = arith.constant 0 : index
    %88 = vector.load %arg14[%c0_72, %c4_73, %c0_74] : memref<1x12x143xf32, #tpu.memory_space<vmem>>, vector<1x1x143xf32>
    %89 = vector.shape_cast %88 : vector<1x1x143xf32> to vector<1x143xf32>
    %90 = vector.shape_cast %87 : vector<1x143xf32> to vector<1x1x143xf32>
    tpu.vector_store %arg14[%c0_72, %c4_73, %c0_74], %90 {strides = array<i32>} : memref<1x12x143xf32, #tpu.memory_space<vmem>>, vector<1x1x143xf32>,
    %c0_75 = arith.constant 0 : index
    %c10 = arith.constant 10 : index
    %c0_76 = arith.constant 0 : index
    %91 = vector.load %arg13[%c0_75, %c10, %c0_76] : memref<1x24x144xf32, #tpu.memory_space<vmem>>, vector<1x1x144xf32>
    %92 = vector.shape_cast %91 : vector<1x1x144xf32> to vector<1x144xf32>
    %c0_77 = arith.constant 0 : index
    %c11 = arith.constant 11 : index
    %c0_78 = arith.constant 0 : index
    %93 = vector.load %arg13[%c0_77, %c11, %c0_78] : memref<1x24x144xf32, #tpu.memory_space<vmem>>, vector<1x1x144xf32>
    %94 = vector.shape_cast %93 : vector<1x1x144xf32> to vector<1x144xf32>
    %95 = arith.maximumf %92, %94 : vector<1x144xf32>
    %96 = vector.extract_strided_slice %95 {offsets = [0, 0], sizes = [1, 143], strides = [1, 1]} : vector<1x144xf32> to vector<1x143xf32>
    %97 = vector.extract_strided_slice %95 {offsets = [0, 1], sizes = [1, 143], strides = [1, 1]} : vector<1x144xf32> to vector<1x143xf32>
    %98 = arith.maximumf %96, %97 : vector<1x143xf32>
    %c0_79 = arith.constant 0 : index
    %c5_80 = arith.constant 5 : index
    %c0_81 = arith.constant 0 : index
    %99 = vector.load %arg14[%c0_79, %c5_80, %c0_81] : memref<1x12x143xf32, #tpu.memory_space<vmem>>, vector<1x1x143xf32>
    %100 = vector.shape_cast %99 : vector<1x1x143xf32> to vector<1x143xf32>
    %101 = vector.shape_cast %98 : vector<1x143xf32> to vector<1x1x143xf32>
    tpu.vector_store %arg14[%c0_79, %c5_80, %c0_81], %101 {strides = array<i32>} : memref<1x12x143xf32, #tpu.memory_space<vmem>>, vector<1x1x143xf32>,
    %c0_82 = arith.constant 0 : index
    %c12 = arith.constant 12 : index
    %c0_83 = arith.constant 0 : index
    %102 = vector.load %arg13[%c0_82, %c12, %c0_83] : memref<1x24x144xf32, #tpu.memory_space<vmem>>, vector<1x1x144xf32>
    %103 = vector.shape_cast %102 : vector<1x1x144xf32> to vector<1x144xf32>
    %c0_84 = arith.constant 0 : index
    %c13 = arith.constant 13 : index
    %c0_85 = arith.constant 0 : index
    %104 = vector.load %arg13[%c0_84, %c13, %c0_85] : memref<1x24x144xf32, #tpu.memory_space<vmem>>, vector<1x1x144xf32>
    %105 = vector.shape_cast %104 : vector<1x1x144xf32> to vector<1x144xf32>
    %106 = arith.maximumf %103, %105 : vector<1x144xf32>
    %107 = vector.extract_strided_slice %106 {offsets = [0, 0], sizes = [1, 143], strides = [1, 1]} : vector<1x144xf32> to vector<1x143xf32>
    %108 = vector.extract_strided_slice %106 {offsets = [0, 1], sizes = [1, 143], strides = [1, 1]} : vector<1x144xf32> to vector<1x143xf32>
    %109 = arith.maximumf %107, %108 : vector<1x143xf32>
    %c0_86 = arith.constant 0 : index
    %c6_87 = arith.constant 6 : index
    %c0_88 = arith.constant 0 : index
    %110 = vector.load %arg14[%c0_86, %c6_87, %c0_88] : memref<1x12x143xf32, #tpu.memory_space<vmem>>, vector<1x1x143xf32>
    %111 = vector.shape_cast %110 : vector<1x1x143xf32> to vector<1x143xf32>
    %112 = vector.shape_cast %109 : vector<1x143xf32> to vector<1x1x143xf32>
    tpu.vector_store %arg14[%c0_86, %c6_87, %c0_88], %112 {strides = array<i32>} : memref<1x12x143xf32, #tpu.memory_space<vmem>>, vector<1x1x143xf32>,
    %c0_89 = arith.constant 0 : index
    %c14 = arith.constant 14 : index
    %c0_90 = arith.constant 0 : index
    %113 = vector.load %arg13[%c0_89, %c14, %c0_90] : memref<1x24x144xf32, #tpu.memory_space<vmem>>, vector<1x1x144xf32>
    %114 = vector.shape_cast %113 : vector<1x1x144xf32> to vector<1x144xf32>
    %c0_91 = arith.constant 0 : index
    %c15 = arith.constant 15 : index
    %c0_92 = arith.constant 0 : index
    %115 = vector.load %arg13[%c0_91, %c15, %c0_92] : memref<1x24x144xf32, #tpu.memory_space<vmem>>, vector<1x1x144xf32>
    %116 = vector.shape_cast %115 : vector<1x1x144xf32> to vector<1x144xf32>
    %117 = arith.maximumf %114, %116 : vector<1x144xf32>
    %118 = vector.extract_strided_slice %117 {offsets = [0, 0], sizes = [1, 143], strides = [1, 1]} : vector<1x144xf32> to vector<1x143xf32>
    %119 = vector.extract_strided_slice %117 {offsets = [0, 1], sizes = [1, 143], strides = [1, 1]} : vector<1x144xf32> to vector<1x143xf32>
    %120 = arith.maximumf %118, %119 : vector<1x143xf32>
    %c0_93 = arith.constant 0 : index
    %c7_94 = arith.constant 7 : index
    %c0_95 = arith.constant 0 : index
    %121 = vector.load %arg14[%c0_93, %c7_94, %c0_95] : memref<1x12x143xf32, #tpu.memory_space<vmem>>, vector<1x1x143xf32>
    %122 = vector.shape_cast %121 : vector<1x1x143xf32> to vector<1x143xf32>
    %123 = vector.shape_cast %120 : vector<1x143xf32> to vector<1x1x143xf32>
    tpu.vector_store %arg14[%c0_93, %c7_94, %c0_95], %123 {strides = array<i32>} : memref<1x12x143xf32, #tpu.memory_space<vmem>>, vector<1x1x143xf32>,
    %c0_96 = arith.constant 0 : index
    %c16 = arith.constant 16 : index
    %c0_97 = arith.constant 0 : index
    %124 = vector.load %arg13[%c0_96, %c16, %c0_97] : memref<1x24x144xf32, #tpu.memory_space<vmem>>, vector<1x1x144xf32>
    %125 = vector.shape_cast %124 : vector<1x1x144xf32> to vector<1x144xf32>
    %c0_98 = arith.constant 0 : index
    %c17 = arith.constant 17 : index
    %c0_99 = arith.constant 0 : index
    %126 = vector.load %arg13[%c0_98, %c17, %c0_99] : memref<1x24x144xf32, #tpu.memory_space<vmem>>, vector<1x1x144xf32>
    %127 = vector.shape_cast %126 : vector<1x1x144xf32> to vector<1x144xf32>
    %128 = arith.maximumf %125, %127 : vector<1x144xf32>
    %129 = vector.extract_strided_slice %128 {offsets = [0, 0], sizes = [1, 143], strides = [1, 1]} : vector<1x144xf32> to vector<1x143xf32>
    %130 = vector.extract_strided_slice %128 {offsets = [0, 1], sizes = [1, 143], strides = [1, 1]} : vector<1x144xf32> to vector<1x143xf32>
    %131 = arith.maximumf %129, %130 : vector<1x143xf32>
    %c0_100 = arith.constant 0 : index
    %c8_101 = arith.constant 8 : index
    %c0_102 = arith.constant 0 : index
    %132 = vector.load %arg14[%c0_100, %c8_101, %c0_102] : memref<1x12x143xf32, #tpu.memory_space<vmem>>, vector<1x1x143xf32>
    %133 = vector.shape_cast %132 : vector<1x1x143xf32> to vector<1x143xf32>
    %134 = vector.shape_cast %131 : vector<1x143xf32> to vector<1x1x143xf32>
    tpu.vector_store %arg14[%c0_100, %c8_101, %c0_102], %134 {strides = array<i32>} : memref<1x12x143xf32, #tpu.memory_space<vmem>>, vector<1x1x143xf32>,
    %c0_103 = arith.constant 0 : index
    %c18 = arith.constant 18 : index
    %c0_104 = arith.constant 0 : index
    %135 = vector.load %arg13[%c0_103, %c18, %c0_104] : memref<1x24x144xf32, #tpu.memory_space<vmem>>, vector<1x1x144xf32>
    %136 = vector.shape_cast %135 : vector<1x1x144xf32> to vector<1x144xf32>
    %c0_105 = arith.constant 0 : index
    %c19 = arith.constant 19 : index
    %c0_106 = arith.constant 0 : index
    %137 = vector.load %arg13[%c0_105, %c19, %c0_106] : memref<1x24x144xf32, #tpu.memory_space<vmem>>, vector<1x1x144xf32>
    %138 = vector.shape_cast %137 : vector<1x1x144xf32> to vector<1x144xf32>
    %139 = arith.maximumf %136, %138 : vector<1x144xf32>
    %140 = vector.extract_strided_slice %139 {offsets = [0, 0], sizes = [1, 143], strides = [1, 1]} : vector<1x144xf32> to vector<1x143xf32>
    %141 = vector.extract_strided_slice %139 {offsets = [0, 1], sizes = [1, 143], strides = [1, 1]} : vector<1x144xf32> to vector<1x143xf32>
    %142 = arith.maximumf %140, %141 : vector<1x143xf32>
    %c0_107 = arith.constant 0 : index
    %c9_108 = arith.constant 9 : index
    %c0_109 = arith.constant 0 : index
    %143 = vector.load %arg14[%c0_107, %c9_108, %c0_109] : memref<1x12x143xf32, #tpu.memory_space<vmem>>, vector<1x1x143xf32>
    %144 = vector.shape_cast %143 : vector<1x1x143xf32> to vector<1x143xf32>
    %145 = vector.shape_cast %142 : vector<1x143xf32> to vector<1x1x143xf32>
    tpu.vector_store %arg14[%c0_107, %c9_108, %c0_109], %145 {strides = array<i32>} : memref<1x12x143xf32, #tpu.memory_space<vmem>>, vector<1x1x143xf32>,
    %c0_110 = arith.constant 0 : index
    %c20 = arith.constant 20 : index
    %c0_111 = arith.constant 0 : index
    %146 = vector.load %arg13[%c0_110, %c20, %c0_111] : memref<1x24x144xf32, #tpu.memory_space<vmem>>, vector<1x1x144xf32>
    %147 = vector.shape_cast %146 : vector<1x1x144xf32> to vector<1x144xf32>
    %c0_112 = arith.constant 0 : index
    %c21 = arith.constant 21 : index
    %c0_113 = arith.constant 0 : index
    %148 = vector.load %arg13[%c0_112, %c21, %c0_113] : memref<1x24x144xf32, #tpu.memory_space<vmem>>, vector<1x1x144xf32>
    %149 = vector.shape_cast %148 : vector<1x1x144xf32> to vector<1x144xf32>
    %150 = arith.maximumf %147, %149 : vector<1x144xf32>
    %151 = vector.extract_strided_slice %150 {offsets = [0, 0], sizes = [1, 143], strides = [1, 1]} : vector<1x144xf32> to vector<1x143xf32>
    %152 = vector.extract_strided_slice %150 {offsets = [0, 1], sizes = [1, 143], strides = [1, 1]} : vector<1x144xf32> to vector<1x143xf32>
    %153 = arith.maximumf %151, %152 : vector<1x143xf32>
    %c0_114 = arith.constant 0 : index
    %c10_115 = arith.constant 10 : index
    %c0_116 = arith.constant 0 : index
    %154 = vector.load %arg14[%c0_114, %c10_115, %c0_116] : memref<1x12x143xf32, #tpu.memory_space<vmem>>, vector<1x1x143xf32>
    %155 = vector.shape_cast %154 : vector<1x1x143xf32> to vector<1x143xf32>
    %156 = vector.shape_cast %153 : vector<1x143xf32> to vector<1x1x143xf32>
    tpu.vector_store %arg14[%c0_114, %c10_115, %c0_116], %156 {strides = array<i32>} : memref<1x12x143xf32, #tpu.memory_space<vmem>>, vector<1x1x143xf32>,
    %c0_117 = arith.constant 0 : index
    %c22 = arith.constant 22 : index
    %c0_118 = arith.constant 0 : index
    %157 = vector.load %arg13[%c0_117, %c22, %c0_118] : memref<1x24x144xf32, #tpu.memory_space<vmem>>, vector<1x1x144xf32>
    %158 = vector.shape_cast %157 : vector<1x1x144xf32> to vector<1x144xf32>
    %c0_119 = arith.constant 0 : index
    %c23 = arith.constant 23 : index
    %c0_120 = arith.constant 0 : index
    %159 = vector.load %arg13[%c0_119, %c23, %c0_120] : memref<1x24x144xf32, #tpu.memory_space<vmem>>, vector<1x1x144xf32>
    %160 = vector.shape_cast %159 : vector<1x1x144xf32> to vector<1x144xf32>
    %161 = arith.maximumf %158, %160 : vector<1x144xf32>
    %162 = vector.extract_strided_slice %161 {offsets = [0, 0], sizes = [1, 143], strides = [1, 1]} : vector<1x144xf32> to vector<1x143xf32>
    %163 = vector.extract_strided_slice %161 {offsets = [0, 1], sizes = [1, 143], strides = [1, 1]} : vector<1x144xf32> to vector<1x143xf32>
    %164 = arith.maximumf %162, %163 : vector<1x143xf32>
    %c0_121 = arith.constant 0 : index
    %c11_122 = arith.constant 11 : index
    %c0_123 = arith.constant 0 : index
    %165 = vector.load %arg14[%c0_121, %c11_122, %c0_123] : memref<1x12x143xf32, #tpu.memory_space<vmem>>, vector<1x1x143xf32>
    %166 = vector.shape_cast %165 : vector<1x1x143xf32> to vector<1x143xf32>
    %167 = vector.shape_cast %164 : vector<1x143xf32> to vector<1x1x143xf32>
    tpu.vector_store %arg14[%c0_121, %c11_122, %c0_123], %167 {strides = array<i32>} : memref<1x12x143xf32, #tpu.memory_space<vmem>>, vector<1x1x143xf32>,
    %c0_124 = arith.constant 0 : index
    %c0_125 = arith.constant 0 : index
    %c0_126 = arith.constant 0 : index
    %168 = vector.load %arg14[%c0_124, %c0_125, %c0_126] : memref<1x12x143xf32, #tpu.memory_space<vmem>>, vector<1x8x143xf32>
    %169 = vector.shape_cast %168 : vector<1x8x143xf32> to vector<8x143xf32>
    %c0_127 = arith.constant 0 : index
    %c0_128 = arith.constant 0 : index
    %c0_129 = arith.constant 0 : index
    %170 = vector.load %arg4[%c0_127, %c0_128, %c0_129] : memref<5x143x128xf32, #tpu.memory_space<vmem>>, vector<1x143x128xf32>
    %171 = vector.shape_cast %170 : vector<1x143x128xf32> to vector<143x128xf32>
    %cst_130 = arith.constant dense<0.000000e+00> : vector<8x128xf32>
    %172 = tpu.matmul %169, %171, %cst_130 {dimension_numbers = #tpu.dot_dimension_numbers<[1], [0], [0], [1], [0, 0, 1, 1], [], []>} : vector<8x143xf32>, vector<143x128xf32>, vector<8x128xf32> -> vector<8x128xf32>
    %c0_131 = arith.constant 0 : index
    %c1_132 = arith.constant 1 : index
    %c0_133 = arith.constant 0 : index
    %173 = vector.load %arg14[%c0_131, %c1_132, %c0_133] : memref<1x12x143xf32, #tpu.memory_space<vmem>>, vector<1x8x143xf32>
    %174 = vector.shape_cast %173 : vector<1x8x143xf32> to vector<8x143xf32>
    %c1_134 = arith.constant 1 : index
    %c0_135 = arith.constant 0 : index
    %c0_136 = arith.constant 0 : index
    %175 = vector.load %arg4[%c1_134, %c0_135, %c0_136] : memref<5x143x128xf32, #tpu.memory_space<vmem>>, vector<1x143x128xf32>
    %176 = vector.shape_cast %175 : vector<1x143x128xf32> to vector<143x128xf32>
    %cst_137 = arith.constant dense<0.000000e+00> : vector<8x128xf32>
    %177 = tpu.matmul %174, %176, %cst_137 {dimension_numbers = #tpu.dot_dimension_numbers<[1], [0], [0], [1], [0, 0, 1, 1], [], []>} : vector<8x143xf32>, vector<143x128xf32>, vector<8x128xf32> -> vector<8x128xf32>
    %178 = arith.addf %172, %177 : vector<8x128xf32>
    %c0_138 = arith.constant 0 : index
    %c2_139 = arith.constant 2 : index
    %c0_140 = arith.constant 0 : index
    %179 = vector.load %arg14[%c0_138, %c2_139, %c0_140] : memref<1x12x143xf32, #tpu.memory_space<vmem>>, vector<1x8x143xf32>
    %180 = vector.shape_cast %179 : vector<1x8x143xf32> to vector<8x143xf32>
    %c2_141 = arith.constant 2 : index
    %c0_142 = arith.constant 0 : index
    %c0_143 = arith.constant 0 : index
    %181 = vector.load %arg4[%c2_141, %c0_142, %c0_143] : memref<5x143x128xf32, #tpu.memory_space<vmem>>, vector<1x143x128xf32>
    %182 = vector.shape_cast %181 : vector<1x143x128xf32> to vector<143x128xf32>
    %cst_144 = arith.constant dense<0.000000e+00> : vector<8x128xf32>
    %183 = tpu.matmul %180, %182, %cst_144 {dimension_numbers = #tpu.dot_dimension_numbers<[1], [0], [0], [1], [0, 0, 1, 1], [], []>} : vector<8x143xf32>, vector<143x128xf32>, vector<8x128xf32> -> vector<8x128xf32>
    %184 = arith.addf %178, %183 : vector<8x128xf32>
    %c0_145 = arith.constant 0 : index
    %c3_146 = arith.constant 3 : index
    %c0_147 = arith.constant 0 : index
    %185 = vector.load %arg14[%c0_145, %c3_146, %c0_147] : memref<1x12x143xf32, #tpu.memory_space<vmem>>, vector<1x8x143xf32>
    %186 = vector.shape_cast %185 : vector<1x8x143xf32> to vector<8x143xf32>
    %c3_148 = arith.constant 3 : index
    %c0_149 = arith.constant 0 : index
    %c0_150 = arith.constant 0 : index
    %187 = vector.load %arg4[%c3_148, %c0_149, %c0_150] : memref<5x143x128xf32, #tpu.memory_space<vmem>>, vector<1x143x128xf32>
    %188 = vector.shape_cast %187 : vector<1x143x128xf32> to vector<143x128xf32>
    %cst_151 = arith.constant dense<0.000000e+00> : vector<8x128xf32>
    %189 = tpu.matmul %186, %188, %cst_151 {dimension_numbers = #tpu.dot_dimension_numbers<[1], [0], [0], [1], [0, 0, 1, 1], [], []>} : vector<8x143xf32>, vector<143x128xf32>, vector<8x128xf32> -> vector<8x128xf32>
    %190 = arith.addf %184, %189 : vector<8x128xf32>
    %c0_152 = arith.constant 0 : index
    %c4_153 = arith.constant 4 : index
    %c0_154 = arith.constant 0 : index
    %191 = vector.load %arg14[%c0_152, %c4_153, %c0_154] : memref<1x12x143xf32, #tpu.memory_space<vmem>>, vector<1x8x143xf32>
    %192 = vector.shape_cast %191 : vector<1x8x143xf32> to vector<8x143xf32>
    %c4_155 = arith.constant 4 : index
    %c0_156 = arith.constant 0 : index
    %c0_157 = arith.constant 0 : index
    %193 = vector.load %arg4[%c4_155, %c0_156, %c0_157] : memref<5x143x128xf32, #tpu.memory_space<vmem>>, vector<1x143x128xf32>
    %194 = vector.shape_cast %193 : vector<1x143x128xf32> to vector<143x128xf32>
    %cst_158 = arith.constant dense<0.000000e+00> : vector<8x128xf32>
    %195 = tpu.matmul %192, %194, %cst_158 {dimension_numbers = #tpu.dot_dimension_numbers<[1], [0], [0], [1], [0, 0, 1, 1], [], []>} : vector<8x143xf32>, vector<143x128xf32>, vector<8x128xf32> -> vector<8x128xf32>
    %196 = arith.addf %190, %195 : vector<8x128xf32>
    %c0_159 = arith.constant 0 : index
    %c0_160 = arith.constant 0 : index
    %197 = vector.load %arg5[%c0_159, %c0_160] : memref<1x128xf32, #tpu.memory_space<vmem>>, vector<1x128xf32>
    %198 = vector.broadcast %197 : vector<1x128xf32> to vector<8x128xf32>
    %199 = arith.addf %196, %198 : vector<8x128xf32>
    %cst_161 = arith.constant 0.000000e+00 : f32
    %200 = vector.broadcast %cst_161 : f32 to vector<8x128xf32>
    %201 = arith.maximumf %199, %200 : vector<8x128xf32>
    %202 = vector.shape_cast %201 : vector<8x128xf32> to vector<1x8x128xf32>
    %c0_162 = arith.constant 0 : index
    %c0_163 = arith.constant 0 : index
    %c0_164 = arith.constant 0 : index
    %203 = vector.load %arg15[%c0_162, %c0_163, %c0_164] : memref<1x8x128xf32, #tpu.memory_space<vmem>>, vector<1x8x128xf32>
    tpu.vector_store %arg15[%c0_162, %c0_163, %c0_164], %202 {strides = array<i32>} : memref<1x8x128xf32, #tpu.memory_space<vmem>>, vector<1x8x128xf32>,
    %c0_165 = arith.constant 0 : index
    %c0_166 = arith.constant 0 : index
    %c0_167 = arith.constant 0 : index
    %204 = vector.load %arg15[%c0_165, %c0_166, %c0_167] : memref<1x8x128xf32, #tpu.memory_space<vmem>>, vector<1x1x128xf32>
    %205 = vector.shape_cast %204 : vector<1x1x128xf32> to vector<1x128xf32>
    %c0_168 = arith.constant 0 : index
    %c1_169 = arith.constant 1 : index
    %c0_170 = arith.constant 0 : index
    %206 = vector.load %arg15[%c0_168, %c1_169, %c0_170] : memref<1x8x128xf32, #tpu.memory_space<vmem>>, vector<1x1x128xf32>
    %207 = vector.shape_cast %206 : vector<1x1x128xf32> to vector<1x128xf32>
    %208 = arith.maximumf %205, %207 : vector<1x128xf32>
    %209 = vector.extract_strided_slice %208 {offsets = [0, 0], sizes = [1, 127], strides = [1, 1]} : vector<1x128xf32> to vector<1x127xf32>
    %210 = vector.extract_strided_slice %208 {offsets = [0, 1], sizes = [1, 127], strides = [1, 1]} : vector<1x128xf32> to vector<1x127xf32>
    %211 = arith.maximumf %209, %210 : vector<1x127xf32>
    %c0_171 = arith.constant 0 : index
    %c0_172 = arith.constant 0 : index
    %c0_173 = arith.constant 0 : index
    %212 = vector.load %arg6[%c0_171, %c0_172, %c0_173] : memref<4x127x120xf32, #tpu.memory_space<vmem>>, vector<1x127x120xf32>
    %213 = vector.shape_cast %212 : vector<1x127x120xf32> to vector<127x120xf32>
    %cst_174 = arith.constant dense<0.000000e+00> : vector<1x120xf32>
    %214 = tpu.matmul %211, %213, %cst_174 {dimension_numbers = #tpu.dot_dimension_numbers<[1], [0], [0], [1], [0, 0, 1, 1], [], []>} : vector<1x127xf32>, vector<127x120xf32>, vector<1x120xf32> -> vector<1x120xf32>
    %c0_175 = arith.constant 0 : index
    %c2_176 = arith.constant 2 : index
    %c0_177 = arith.constant 0 : index
    %215 = vector.load %arg15[%c0_175, %c2_176, %c0_177] : memref<1x8x128xf32, #tpu.memory_space<vmem>>, vector<1x1x128xf32>
    %216 = vector.shape_cast %215 : vector<1x1x128xf32> to vector<1x128xf32>
    %c0_178 = arith.constant 0 : index
    %c3_179 = arith.constant 3 : index
    %c0_180 = arith.constant 0 : index
    %217 = vector.load %arg15[%c0_178, %c3_179, %c0_180] : memref<1x8x128xf32, #tpu.memory_space<vmem>>, vector<1x1x128xf32>
    %218 = vector.shape_cast %217 : vector<1x1x128xf32> to vector<1x128xf32>
    %219 = arith.maximumf %216, %218 : vector<1x128xf32>
    %220 = vector.extract_strided_slice %219 {offsets = [0, 0], sizes = [1, 127], strides = [1, 1]} : vector<1x128xf32> to vector<1x127xf32>
    %221 = vector.extract_strided_slice %219 {offsets = [0, 1], sizes = [1, 127], strides = [1, 1]} : vector<1x128xf32> to vector<1x127xf32>
    %222 = arith.maximumf %220, %221 : vector<1x127xf32>
    %c1_181 = arith.constant 1 : index
    %c0_182 = arith.constant 0 : index
    %c0_183 = arith.constant 0 : index
    %223 = vector.load %arg6[%c1_181, %c0_182, %c0_183] : memref<4x127x120xf32, #tpu.memory_space<vmem>>, vector<1x127x120xf32>
    %224 = vector.shape_cast %223 : vector<1x127x120xf32> to vector<127x120xf32>
    %cst_184 = arith.constant dense<0.000000e+00> : vector<1x120xf32>
    %225 = tpu.matmul %222, %224, %cst_184 {dimension_numbers = #tpu.dot_dimension_numbers<[1], [0], [0], [1], [0, 0, 1, 1], [], []>} : vector<1x127xf32>, vector<127x120xf32>, vector<1x120xf32> -> vector<1x120xf32>
    %226 = arith.addf %214, %225 : vector<1x120xf32>
    %c0_185 = arith.constant 0 : index
    %c4_186 = arith.constant 4 : index
    %c0_187 = arith.constant 0 : index
    %227 = vector.load %arg15[%c0_185, %c4_186, %c0_187] : memref<1x8x128xf32, #tpu.memory_space<vmem>>, vector<1x1x128xf32>
    %228 = vector.shape_cast %227 : vector<1x1x128xf32> to vector<1x128xf32>
    %c0_188 = arith.constant 0 : index
    %c5_189 = arith.constant 5 : index
    %c0_190 = arith.constant 0 : index
    %229 = vector.load %arg15[%c0_188, %c5_189, %c0_190] : memref<1x8x128xf32, #tpu.memory_space<vmem>>, vector<1x1x128xf32>
    %230 = vector.shape_cast %229 : vector<1x1x128xf32> to vector<1x128xf32>
    %231 = arith.maximumf %228, %230 : vector<1x128xf32>
    %232 = vector.extract_strided_slice %231 {offsets = [0, 0], sizes = [1, 127], strides = [1, 1]} : vector<1x128xf32> to vector<1x127xf32>
    %233 = vector.extract_strided_slice %231 {offsets = [0, 1], sizes = [1, 127], strides = [1, 1]} : vector<1x128xf32> to vector<1x127xf32>
    %234 = arith.maximumf %232, %233 : vector<1x127xf32>
    %c2_191 = arith.constant 2 : index
    %c0_192 = arith.constant 0 : index
    %c0_193 = arith.constant 0 : index
    %235 = vector.load %arg6[%c2_191, %c0_192, %c0_193] : memref<4x127x120xf32, #tpu.memory_space<vmem>>, vector<1x127x120xf32>
    %236 = vector.shape_cast %235 : vector<1x127x120xf32> to vector<127x120xf32>
    %cst_194 = arith.constant dense<0.000000e+00> : vector<1x120xf32>
    %237 = tpu.matmul %234, %236, %cst_194 {dimension_numbers = #tpu.dot_dimension_numbers<[1], [0], [0], [1], [0, 0, 1, 1], [], []>} : vector<1x127xf32>, vector<127x120xf32>, vector<1x120xf32> -> vector<1x120xf32>
    %238 = arith.addf %226, %237 : vector<1x120xf32>
    %c0_195 = arith.constant 0 : index
    %c6_196 = arith.constant 6 : index
    %c0_197 = arith.constant 0 : index
    %239 = vector.load %arg15[%c0_195, %c6_196, %c0_197] : memref<1x8x128xf32, #tpu.memory_space<vmem>>, vector<1x1x128xf32>
    %240 = vector.shape_cast %239 : vector<1x1x128xf32> to vector<1x128xf32>
    %c0_198 = arith.constant 0 : index
    %c7_199 = arith.constant 7 : index
    %c0_200 = arith.constant 0 : index
    %241 = vector.load %arg15[%c0_198, %c7_199, %c0_200] : memref<1x8x128xf32, #tpu.memory_space<vmem>>, vector<1x1x128xf32>
    %242 = vector.shape_cast %241 : vector<1x1x128xf32> to vector<1x128xf32>
    %243 = arith.maximumf %240, %242 : vector<1x128xf32>
    %244 = vector.extract_strided_slice %243 {offsets = [0, 0], sizes = [1, 127], strides = [1, 1]} : vector<1x128xf32> to vector<1x127xf32>
    %245 = vector.extract_strided_slice %243 {offsets = [0, 1], sizes = [1, 127], strides = [1, 1]} : vector<1x128xf32> to vector<1x127xf32>
    %246 = arith.maximumf %244, %245 : vector<1x127xf32>
    %c3_201 = arith.constant 3 : index
    %c0_202 = arith.constant 0 : index
    %c0_203 = arith.constant 0 : index
    %247 = vector.load %arg6[%c3_201, %c0_202, %c0_203] : memref<4x127x120xf32, #tpu.memory_space<vmem>>, vector<1x127x120xf32>
    %248 = vector.shape_cast %247 : vector<1x127x120xf32> to vector<127x120xf32>
    %cst_204 = arith.constant dense<0.000000e+00> : vector<1x120xf32>
    %249 = tpu.matmul %246, %248, %cst_204 {dimension_numbers = #tpu.dot_dimension_numbers<[1], [0], [0], [1], [0, 0, 1, 1], [], []>} : vector<1x127xf32>, vector<127x120xf32>, vector<1x120xf32> -> vector<1x120xf32>
    %250 = arith.addf %238, %249 : vector<1x120xf32>
    %c0_205 = arith.constant 0 : index
    %c0_206 = arith.constant 0 : index
    %251 = vector.load %arg7[%c0_205, %c0_206] : memref<1x120xf32, #tpu.memory_space<vmem>>, vector<1x120xf32>
    %252 = arith.addf %250, %251 : vector<1x120xf32>
    %cst_207 = arith.constant 0.000000e+00 : f32
    %253 = vector.broadcast %cst_207 : f32 to vector<1x120xf32>
    %254 = arith.maximumf %252, %253 : vector<1x120xf32>
    %c0_208 = arith.constant 0 : index
    %c0_209 = arith.constant 0 : index
    %255 = vector.load %arg8[%c0_208, %c0_209] : memref<120x84xf32, #tpu.memory_space<vmem>>, vector<120x84xf32>
    %cst_210 = arith.constant dense<0.000000e+00> : vector<1x84xf32>
    %256 = tpu.matmul %254, %255, %cst_210 {dimension_numbers = #tpu.dot_dimension_numbers<[1], [0], [0], [1], [0, 0, 1, 1], [], []>} : vector<1x120xf32>, vector<120x84xf32>, vector<1x84xf32> -> vector<1x84xf32>
    %c0_211 = arith.constant 0 : index
    %c0_212 = arith.constant 0 : index
    %257 = vector.load %arg9[%c0_211, %c0_212] : memref<1x84xf32, #tpu.memory_space<vmem>>, vector<1x84xf32>
    %258 = arith.addf %256, %257 : vector<1x84xf32>
    %cst_213 = arith.constant 0.000000e+00 : f32
    %259 = vector.broadcast %cst_213 : f32 to vector<1x84xf32>
    %260 = arith.maximumf %258, %259 : vector<1x84xf32>
    %c0_214 = arith.constant 0 : index
    %c0_215 = arith.constant 0 : index
    %261 = vector.load %arg10[%c0_214, %c0_215] : memref<84x10xf32, #tpu.memory_space<vmem>>, vector<84x10xf32>
    %cst_216 = arith.constant dense<0.000000e+00> : vector<1x10xf32>
    %262 = tpu.matmul %260, %261, %cst_216 {dimension_numbers = #tpu.dot_dimension_numbers<[1], [0], [0], [1], [0, 0, 1, 1], [], []>} : vector<1x84xf32>, vector<84x10xf32>, vector<1x10xf32> -> vector<1x10xf32>
    %c0_217 = arith.constant 0 : index
    %c0_218 = arith.constant 0 : index
    %263 = vector.load %arg11[%c0_217, %c0_218] : memref<1x10xf32, #tpu.memory_space<vmem>>, vector<1x10xf32>
    %264 = arith.addf %262, %263 : vector<1x10xf32>
    %c0_219 = arith.constant 0 : index
    %c0_220 = arith.constant 0 : index
    %c0_221 = arith.constant 0 : index
    %265 = vector.load %arg12[%c0_219, %c0_220, %c0_221] : memref<1x1x10xf32, #tpu.memory_space<vmem>>, vector<1x1x10xf32>
    %266 = vector.shape_cast %265 : vector<1x1x10xf32> to vector<1x10xf32>
    %267 = vector.shape_cast %264 : vector<1x10xf32> to vector<1x1x10xf32>
    tpu.vector_store %arg12[%c0_219, %c0_220, %c0_221], %267 {strides = array<i32>} : memref<1x1x10xf32, #tpu.memory_space<vmem>>, vector<1x1x10xf32>,
    return
  }
  func.func @transform_0(%arg0: i32) -> (i32, i32, i32) {
    %c0_i32 = arith.constant 0 : i32
    %c0_i32_0 = arith.constant 0 : i32
    %c0_i32_1 = arith.constant 0 : i32
    return %arg0, %c0_i32, %c0_i32_0 : i32, i32, i32
  }
  func.func @transform_1(%arg0: i32) -> (i32, i32, i32) {
    %c0_i32 = arith.constant 0 : i32
    %c0_i32_0 = arith.constant 0 : i32
    %c0_i32_1 = arith.constant 0 : i32
    %c0_i32_2 = arith.constant 0 : i32
    return %c0_i32, %c0_i32_0, %c0_i32_1 : i32, i32, i32
  }
  func.func @transform_2(%arg0: i32) -> (i32, i32) {
    %c0_i32 = arith.constant 0 : i32
    %c0_i32_0 = arith.constant 0 : i32
    %c0_i32_1 = arith.constant 0 : i32
    return %c0_i32, %c0_i32_0 : i32, i32
  }
  func.func @transform_3(%arg0: i32) -> (i32, i32, i32) {
    %c0_i32 = arith.constant 0 : i32
    %c0_i32_0 = arith.constant 0 : i32
    %c0_i32_1 = arith.constant 0 : i32
    %c0_i32_2 = arith.constant 0 : i32
    return %c0_i32, %c0_i32_0, %c0_i32_1 : i32, i32, i32
  }
  func.func @transform_4(%arg0: i32) -> (i32, i32) {
    %c0_i32 = arith.constant 0 : i32
    %c0_i32_0 = arith.constant 0 : i32
    %c0_i32_1 = arith.constant 0 : i32
    return %c0_i32, %c0_i32_0 : i32, i32
  }
  func.func @transform_5(%arg0: i32) -> (i32, i32, i32) {
    %c0_i32 = arith.constant 0 : i32
    %c0_i32_0 = arith.constant 0 : i32
    %c0_i32_1 = arith.constant 0 : i32
    %c0_i32_2 = arith.constant 0 : i32
    return %c0_i32, %c0_i32_0, %c0_i32_1 : i32, i32, i32
  }
  func.func @transform_6(%arg0: i32) -> (i32, i32) {
    %c0_i32 = arith.constant 0 : i32
    %c0_i32_0 = arith.constant 0 : i32
    %c0_i32_1 = arith.constant 0 : i32
    return %c0_i32, %c0_i32_0 : i32, i32
  }
  func.func @transform_7(%arg0: i32) -> (i32, i32) {
    %c0_i32 = arith.constant 0 : i32
    %c0_i32_0 = arith.constant 0 : i32
    %c0_i32_1 = arith.constant 0 : i32
    return %c0_i32, %c0_i32_0 : i32, i32
  }
  func.func @transform_8(%arg0: i32) -> (i32, i32) {
    %c0_i32 = arith.constant 0 : i32
    %c0_i32_0 = arith.constant 0 : i32
    %c0_i32_1 = arith.constant 0 : i32
    return %c0_i32, %c0_i32_0 : i32, i32
  }
  func.func @transform_9(%arg0: i32) -> (i32, i32) {
    %c0_i32 = arith.constant 0 : i32
    %c0_i32_0 = arith.constant 0 : i32
    %c0_i32_1 = arith.constant 0 : i32
    return %c0_i32, %c0_i32_0 : i32, i32
  }
  func.func @transform_10(%arg0: i32) -> (i32, i32) {
    %c0_i32 = arith.constant 0 : i32
    %c0_i32_0 = arith.constant 0 : i32
    %c0_i32_1 = arith.constant 0 : i32
    return %c0_i32, %c0_i32_0 : i32, i32
  }
  func.func @transform_11(%arg0: i32) -> (i32, i32, i32) {
    %c0_i32 = arith.constant 0 : i32
    %c0_i32_0 = arith.constant 0 : i32
    %c0_i32_1 = arith.constant 0 : i32
    return %arg0, %c0_i32, %c0_i32_0 : i32, i32, i32
  }
}

</mosaic_0001>

<bundles_post_ra>
// kernel: net_forward.1
= control target key start
LH: loop header
LB: loop body
LE: loop exit
PB: predicated region body
PF: predicated region fallthrough
CT: control target
= control target key end

     0   :  { %16 = vsyncpa [#allocation6], 0  ;;  %s4206_s0 = inlined_call_operand.vmem [shape: f32[2,28,28], index: 0, kind: input, shape index: {}]   ;;  %s4207_s1 = inlined_call_operand.vmem [shape: f32[5,28,144], index: 1, kind: input, shape index: {}]   ;;  %s4208_s2 = inlined_call_operand.vmem [shape: f32[1,144], index: 2, kind: input, shape index: {}]   ;;  %s4209_s3 = inlined_call_operand.vmem [shape: f32[5,143,128], index: 3, kind: input, shape index: {}]   ;;  %s4210_s4 = inlined_call_operand.vmem [shape: f32[1,128], index: 4, kind: input, shape index: {}]   ;;  %s4211_s5 = inlined_call_operand.vmem [shape: f32[4,127,120], index: 5, kind: input, shape index: {}]   ;;  %s4212_s6 = inlined_call_operand.vmem [shape: f32[1,120], index: 6, kind: input, shape index: {}]   ;;  %s4213_s7 = inlined_call_operand.vmem [shape: f32[120,84], index: 7, kind: input, shape index: {}]   ;;  %s4214_s8 = inlined_call_operand.vmem [shape: f32[1,84], index: 8, kind: input, shape index: {}]   ;;  %s4215_s9 = inlined_call_operand.vmem [shape: f32[84,10], index: 9, kind: input, shape index: {}]   ;;  %s4216_s10 = inlined_call_operand.vmem [shape: f32[1,10], index: 10, kind: input, shape index: {}]   ;;  %s4217_s11 = inlined_call_operand.hbm [shape: f32[2,1,10], index: 11, kind: output, shape index: {}]  }
   0x1   :  { %18 = vsyncpa [#allocation6 + $0x1], 0  ;;  %s3045_s17 = smov 0   ;;  %s3047_s18 = smov 0  }
   0x2   :  { %s3049_s19 = smov 0   ;;  %s3051_s20 = smov 0  }
   0x3 LB: > { %s3066_s21 = sadd.s32 4294967295, %s2979_s20   ;;  %s2374_s22 = sadd.s32 4294967294, %s2979_s20   ;;  %s2979_s20 = sphi %s3051_s20, %s4227_s20   ;;  %s2975_s19 = sphi %s3049_s19, %s4226_s19   ;;  %s2971_s18 = sphi %s3047_s18, %s4225_s18   ;;  %s2967_s17 = sphi %s3045_s17, %s4224_s17  }
   0x4   : > { %s3070_s23 = sadd.s32 1, %s2979_s20   ;;  %s267_s24 = sadd.s32 1, %s2975_s19 }
   0x5   : > { %s264_s25 = ssub.s32 %s2979_s20, %s3070_s23  ;;  %p277_p0 = scmp.ne.s32.totalorder %s2975_s19, %s2971_s18 }
   0x6   : > { %p265_p1 = scmp.eq.s32.totalorder %s264_s25, 0  ;;  %p278_p2 = scmp.eq.s32.totalorder %s3066_s21, 1 }
   0x7   : > { %p283_p3 = scmp.ne.s32.totalorder %s2971_s18, %s2967_s17  ;;  %p284_p4 = scmp.eq.s32.totalorder %s2374_s22, 1 }
   0x8   : > { %s3081_s26 = scalar_select %p265_p1, %s2975_s19, %s267_s24  }
   0x9   : > { %p3083_p5 = por %p278_p2, %p277_p0  ;;  %p3087_p6 = por %p284_p4, %p283_p3 }
   0xa   : > { %4218 = sst [smem:[#allocation8_spill]] %s3081_s26  ;;  %p2377_p7 = scmp.ge.s32.totalorder %s2979_s20, 1 }
   0xb   : > { %p340_p8 = scmp.lt.s32.totalorder %s2979_s20, 3 }
   0xd   : > { %p341_p9 = pnand %p2377_p7, %p340_p8 }
   0xe   : > { %p379_p10 = scmp.lt.s32.totalorder (!%p341_p9), %s3066_s21, 1  ;;  %s2982_s14 = smov (!%p341_p9), 127  }
   0xf   : > { %344 = sbr.rel (%p341_p9) target bundleno = 1460 (0x5b4), region = 64  ;;  %s377_s24 = sand.u32 (!%p341_p9), 1, %s2971_s18  }
  0x10   : > { %s378_s13 = scalar_lea.vmem (!%p341_p9), [#allocation5], %s377_s24 }
  0x14   : > { %v2387_v0 = vld [vmem:[%s4207_s1 + $0x78] sm:$0xf]  ;;  %vm417_vm0 = vcmask 1043456   ;;  %v2386_v1 = vld [vmem:[%s4207_s1 + $0x70] sm:$0xf]  ;;  %v2385_v2 = vld [vmem:[%s4207_s1 + $0x68] sm:$0xff] }
  0x15   : > { %2388 = vmatprep.subr.msk.mxu0 %vm417_vm0, %v2387_v0  ;;  %v2384_v3 = vld [vmem:[%s4207_s1 + $0x60] sm:$0xff]  ;;  %v2383_v4 = vld [vmem:[%s4207_s1 + $0x58] sm:$0xff]  ;;  %v2981_v5 = vmov 0.0   ;;  %v2382_v6 = vld [vmem:[%s4207_s1 + $0x50] sm:$0xff]  ;;  %s380_s12 = scalar_select %p379_p10, %s3066_s21, 1  ;;  %vm407_vm1 = vcmask 228352  }
  0x16   : > { %2389 = vmatpush1.msk.msra.mxu0 %vm417_vm0, %v2386_v1  ;;  %488 = vmatprep.mubr.f32.mxu0 %v2981_v5  ;;  %v2381_v7 = vld [vmem:[%s4207_s1 + $0x48] sm:$0xff]  ;;  %v2380_v8 = vld [vmem:[%s4207_s1 + $0x40] sm:$0xff]  ;;  %v394_v9 = vld [vmem:[%s4207_s1 + $0x38] sm:$0xf]  ;;  %vm978_vm2 = vcmask 130048   ;;  %vm1214_vm3 = vcmask 1046528  }
  0x17   : > { %450 = vmatprep.subr.mxu0 %v2385_v2  ;;  %812 = vmatprep.mubr.f32.mxu1 %v2981_v5  ;;  %s2582_s22 = sshll.u32 %s380_s12, 5  ;;  %v393_v11 = vld [vmem:[%s4207_s1 + $0x30] sm:$0xf]  ;;  %v392_v12 = vld [vmem:[%s4207_s1 + $0x28] sm:$0xff]  ;;  %v2418_v13 = vld [vmem:[%s4207_s1 + $0xf8] sm:$0xf] }
  0x18   : > { %451 = vmatpush1.msra.mxu0 %v2384_v3  ;;  %s3126_s29 = scalar_lea.vmem %s4206_s0, %s2582_s22  ;;  %v391_v14 = vld [vmem:[%s4207_s1 + $0x20] sm:$0xff]  ;;  %v2417_v15 = vld [vmem:[%s4207_s1 + $0xf0] sm:$0xf]  ;;  %v390_v17 = vld [vmem:[%s4207_s1 + $0x18] sm:$0xff]  ;;  %2419 = vmatprep.subr.msk.mxu1 %vm417_vm0, %v2418_v13  ;;  %v955_v13 = vlaneseq  ;;  %vm992_vm4 = vcmask 1039360   ;;  %vm1222_vm6 = vcmask 121856  }
  0x19   : > { %452 = vmatprep.subr.mxu0 %v2383_v4  ;;  %v395_v10 = vld [vmem:[%s3126_s29 + $0x1] sm:$0xff]  ;;  %v396_v16 = vld [vmem:[%s3126_s29 + $0x9] sm:$0xff]  ;;  %2420 = vmatpush1.msk.msra.mxu1 %vm417_vm0, %v2417_v15  ;;  %v397_v23 = vld [vmem:[%s3126_s29 + $0x11] sm:$0xff]  ;;  %vm1401_vm7 = vcmask 1045504   ;;  %vm1512_vm8 = vcmask 1044480   ;;  %vm2983_vm9 = vmmov 0  }
  0x1a   : > { %453 = vmatpush1.msra.mxu0 %v2382_v6  ;;  %v389_v18 = vld [vmem:[%s4207_s1 + $0x10] sm:$0xff]  ;;  %v388_v19 = vld [vmem:[%s4207_s1 + $0x8] sm:$0xff]  ;;  %v387_v21 = vld [vmem:[%s4207_s1] sm:$0xff]  ;;  %vm3479_vm5 = vcmp.lt.s32.totalorder %v955_v13, 143  ;;  %vm2140_vm10 = vcmask 982016   ;;  %vm2227_vm11 = vcmask 687104  }
  0x1b   : > { %454 = vmatprep.subr.mxu0 %v2381_v7  ;;  %v2416_v20 = vld [vmem:[%s4207_s1 + $0xe8] sm:$0xff]  ;;  %v2415_v22 = vld [vmem:[%s4207_s1 + $0xe0] sm:$0xff]  ;;  %v2405_v24 = vld [vmem:[%s4207_s1 + $0xb8] sm:$0xf]  ;;  %s2319_s12 = sshll.u32 %s378_s13, 4  ;;  %vm2304_vm12 = vcmask 73728   ;;  %s2320_s12 = int_to_ptr.vmem [resolvable:$true] %s2319_s12 }
  0x1c   : > { %455 = vmatpush1.msra.mxu0 %v2380_v8  ;;  %774 = vmatprep.subr.mxu1 %v2416_v20  ;;  %v2414_v25 = vld [vmem:[%s4207_s1 + $0xd8] sm:$0xff]  ;;  %v2413_v26 = vld [vmem:[%s4207_s1 + $0xd0] sm:$0xff]  ;;  %v2412_v27 = vld [vmem:[%s4207_s1 + $0xc8] sm:$0xff]  ;;  %s2307_s22 = scalar_lea.sflag [#allocation6], %s377_s24  ;;  %s2919_s26 = scalar_lea.vmem %s2320_s12, 16 }
  0x1d   : > { %2390 = vmatmul.mubr.msk.f32.vlgmr.msra.gmra.mxu0 %vm407_vm1, %v395_v10  ;;  %2393 = vmatprep.subr.msk.mxu0 %vm417_vm0, %v394_v9  ;;  %v384_v28 = vld [vmem:[%s3126_s29] sm:$0xff]  ;;  %v2404_v30 = vld [vmem:[%s4207_s1 + $0xb0] sm:$0xf]  ;;  %v2403_v31 = vld [vmem:[%s4207_s1 + $0xa8] sm:$0xff]  ;;  %p2920_p11 = scmp.ne.s32.totalorder %s2320_s12, %s2919_s26 }
  0x1e   : > { %2394 = vmatpush1.msk.msra.mxu0 %vm417_vm0, %v393_v11  ;;  %494 = vmatprep.mubr.f32.mxu0 %v2981_v5  ;;  %v2411_v29 = vld [vmem:[%s4207_s1 + $0xc0] sm:$0xff]  ;;  %v385_v34 = vld [vmem:[%s3126_s29 + $0x8] sm:$0xff]  ;;  %v2401_v35 = vld [vmem:[%s4207_s1 + $0x98] sm:$0xff] }
  0x1f   : > { %548 = vmatprep.subr.mxu0 %v392_v12  ;;  %775 = vmatpush1.msra.mxu1 %v2415_v22  ;;  %v721_v32 = vld [vmem:[%s3126_s29 + $0x3] sm:$0xff]  ;;  %v2400_v36 = vld [vmem:[%s4207_s1 + $0x90] sm:$0xff]  ;;  %v2431_v41 = vld [vmem:[%s4207_s1 + $0x138] sm:$0xf]  ;;  %p2921_p12 = pnand %p2920_p11, %p3083_p5 }
  0x20   : > { %549 = vmatpush1.msra.mxu0 %v391_v14  ;;  %776 = vmatprep.subr.mxu1 %v2414_v25  ;;  %v2402_v33 = vld [vmem:[%s4207_s1 + $0xa0] sm:$0xff]  ;;  %v2399_v37 = vld [vmem:[%s4207_s1 + $0x88] sm:$0xff]  ;;  %v386_v40 = vld [vmem:[%s3126_s29 + $0x10] sm:$0xff] }
  0x21   : > { %2391 = vmatmul.mubr.msk.f32.gmra.mxu0 %vm407_vm1, %v396_v16  ;;  %550 = vmatprep.subr.mxu0 %v390_v17  ;;  %v722_v38 = vld [vmem:[%s3126_s29 + $0xb] sm:$0xff]  ;;  %v2398_v39 = vld [vmem:[%s4207_s1 + $0x80] sm:$0xff]  ;;  %v723_v42 = vld [vmem:[%s3126_s29 + $0x13] sm:$0xff]  ;;  %v956_v17 = vshrl.u32 %v955_v13, 7  ;;  %p2922_p13 = pneg %p2921_p12 }
  0x22   : > { %500 = vmatprep.mubr.f32.mxu0 %v2981_v5  ;;  %551 = vmatpush1.msra.mxu0 %v389_v18  ;;  %v605_v43 = vld [vmem:[%s3126_s29 + $0x2] sm:$0xff]  ;;  %v2430_v44 = vld [vmem:[%s4207_s1 + $0x130] sm:$0xf]  ;;  %v2427_v48 = vld [vmem:[%s4207_s1 + $0x118] sm:$0xff] }
  0x23   : > { %552 = vmatprep.subr.mxu0 %v388_v19  ;;  %777 = vmatpush1.msra.mxu1 %v2413_v26  ;;  %v2429_v45 = vld [vmem:[%s4207_s1 + $0x128] sm:$0xff]  ;;  %v2428_v46 = vld [vmem:[%s4207_s1 + $0x120] sm:$0xff]  ;;  %v2426_v49 = vld [vmem:[%s4207_s1 + $0x110] sm:$0xff] }
  0x24   : > { %553 = vmatpush1.msra.mxu0 %v387_v21  ;;  %778 = vmatprep.subr.mxu1 %v2412_v27  ;;  %v606_v47 = vld [vmem:[%s3126_s29 + $0xa] sm:$0xff]  ;;  %v2424_v51 = vld [vmem:[%s4207_s1 + $0x100] sm:$0xff]  ;;  %v607_v52 = vld [vmem:[%s3126_s29 + $0x12] sm:$0xff] }
  0x25   : > { %2392 = vmatmul.mubr.msk.f32.gmra.mxu0 %vm407_vm1, %v397_v23  ;;  %2406 = vmatprep.subr.msk.mxu0 %vm417_vm0, %v2405_v24  ;;  %v2425_v50 = vld [vmem:[%s4207_s1 + $0x108] sm:$0xff]  ;;  %v839_v55 = vld [vmem:[%s3126_s29 + $0x14] sm:$0xff]  ;;  %v2451_v58 = vld [vmem:[%s4209_s3 + $0x100] sm:$0xff]  ;;  %v957_v24 = vsub.s32 0, %v956_v17 }
  0x26   : > { %586 = vmatprep.mubr.f32.mxu0 %v2981_v5  ;;  %779 = vmatpush1.msra.mxu1 %v2411_v29  ;;  %v837_v53 = vld [vmem:[%s3126_s29 + $0x4] sm:$0xff]  ;;  %v838_v54 = vld [vmem:[%s3126_s29 + $0xc] sm:$0xff]  ;;  %v1184_v57 = vld [vmem:[%s4209_s3 + $0x78] sm:$0xff]  ;;  %v961_v29 = vsub.s32 1, %v956_v17  ;;  %s2579_s29 = sshll.u32 %s3066_s21, 4  ;;  %s2984_s21 = smov [#allocation5]  }
  0x27   : > { %2421 = vmatmul.mubr.msk.f32.vlgmr.msra.gmra.mxu1 %vm407_vm1, %v721_v32  ;;  %1228 = vmatprep.subr.mxu1 %v2981_v5  ;;  %v2452_v56 = vld [vmem:[%s4209_s3 + $0x108] sm:$0xff]  ;;  %v1183_v59 = vld [vmem:[%s4209_s3 + $0x70] sm:$0xff]  ;;  %v2450_v60 = vld [vmem:[%s4209_s3 + $0xf8] sm:$0xff]  ;;  %s4171_s16 = scalar_lea.hbm %s4217_s11, %s2579_s29  ;;  %s2923_s25 = sshll.u32 %s2984_s21, 4  ;;  %s2924_s25 = int_to_ptr.vmem [resolvable:$false] %s2923_s25 }
  0x28   : > { %818 = vmatprep.mubr.f32.mxu1 %v2981_v5  ;;  %1229 = vmatpush1.msra.mxu1 %v2452_v56  ;;  %v1182_v61 = vld [vmem:[%s4209_s3 + $0x68] sm:$0xff]  ;;  %v2449_v62 = vld [vmem:[%s4209_s3 + $0xf0] sm:$0xff]  ;;  %v953_v26 = vld [vmem:[%s4208_s2] sm:$0x3]  ;;  %s2925_s30 = scalar_lea.vmem %s2924_s25, 32  ;;  %p2926_p0 = scmp.lt.s32.totalorder %s2320_s12, %s2924_s25 }
  0x29   : > { %2395 = vmatmul.mubr.msk.f32.vlgmr.msra.gmra.mxu0 %vm407_vm1, %v384_v28  ;;  %1230 = vmatprep.subr.mxu1 %v2981_v5  ;;  %p2927_p1 = scmp.lt.s32.totalorder %s2925_s30, %s2919_s26 }
  0x2a   : > { %2407 = vmatpush1.msk.msra.mxu0 %vm417_vm0, %v2404_v30  ;;  %592 = vmatprep.mubr.f32.mxu0 %v2981_v5 }
  0x2b   : > { %658 = vmatprep.subr.mxu0 %v2403_v31  ;;  %2422 = vmatmul.mubr.msk.f32.gmra.mxu1 %vm407_vm1, %v722_v38  ;;  %p2928_p2 = por %p2927_p1, %p2926_p0 }
  0x2c   : > { %659 = vmatpush1.msra.mxu0 %v2402_v33  ;;  %824 = vmatprep.mubr.f32.mxu1 %v2981_v5 }
  0x2d   : > { %2396 = vmatmul.mubr.msk.f32.gmra.mxu0 %vm407_vm1, %v385_v34  ;;  %660 = vmatprep.subr.mxu0 %v2401_v35  ;;  %v958_v35 = vrot.slane %v953_v26, %v957_v24  ;;  %p2929_p3 = pnand %p2928_p2, %p2922_p13 }
  0x2e   : > { %598 = vmatprep.mubr.f32.mxu0 %v2981_v5  ;;  %661 = vmatpush1.msra.mxu0 %v2400_v36 }
  0x2f   : > { %662 = vmatprep.subr.mxu0 %v2399_v37  ;;  %2423 = vmatmul.mubr.msk.f32.gmra.mxu1 %vm407_vm1, %v723_v42 }
  0x30   : > { %663 = vmatpush1.msra.mxu0 %v2398_v39  ;;  %1231 = vmatpush1.msra.mxu1 %v2451_v58 }
  0x31   : > { %2397 = vmatmul.mubr.msk.f32.gmra.mxu0 %vm407_vm1, %v386_v40  ;;  %2432 = vmatprep.subr.msk.mxu0 %vm417_vm0, %v2431_v41  ;;  %v962_v41 = vrot.slane %v953_v26, %v961_v29 }
  0x32   : > { %696 = vmatprep.mubr.f32.mxu0 %v2981_v5  ;;  %1232 = vmatprep.subr.mxu1 %v2981_v5 }
  0x33   : > { %1233 = vmatpush1.msra.mxu1 %v2450_v60 }
  0x34   : > { %1234 = vmatprep.subr.mxu1 %v2981_v5 }
  0x35   : > { %2408 = vmatmul.mubr.msk.f32.vlgmr.msra.gmra.mxu0 %vm407_vm1, %v605_v43  ;;  %1235 = vmatpush1.msra.mxu1 %v2449_v62  ;;  %v1181_v62 = vld [vmem:[%s4209_s3 + $0x60] sm:$0xff] }
  0x36   : > { %2433 = vmatpush1.msk.msra.mxu0 %vm417_vm0, %v2430_v44  ;;  %702 = vmatprep.mubr.f32.mxu0 %v2981_v5 }
  0x37   : > { %890 = vmatprep.subr.mxu0 %v2429_v45  ;;  %1236 = vmatprep.subr.mxu1 %v2981_v5 }
  0x38   : > { %891 = vmatpush1.msra.mxu0 %v2428_v46 }
  0x39   : > { %2409 = vmatmul.mubr.msk.f32.gmra.mxu0 %vm407_vm1, %v606_v47  ;;  %892 = vmatprep.subr.mxu0 %v2427_v48 }
  0x3a   : > { %708 = vmatprep.mubr.f32.mxu0 %v2981_v5  ;;  %893 = vmatpush1.msra.mxu0 %v2426_v49 }
  0x3b   : > { %894 = vmatprep.subr.mxu0 %v2425_v50 }
  0x3c   : > { %895 = vmatpush1.msra.mxu0 %v2424_v51 }
  0x3d   : > { %2410 = vmatmul.mubr.msk.f32.gmra.mxu0 %vm407_vm1, %v607_v52  ;;  %1304 = vmatprep.subr.mxu0 %v2981_v5 }
  0x3e   : > { %928 = vmatprep.mubr.f32.mxu0 %v2981_v5 }
  0x41   : > { %2434 = vmatmul.mubr.msk.f32.vlgmr.msra.gmra.mxu0 %vm407_vm1, %v837_v53 }
  0x42   : > { %934 = vmatprep.mubr.f32.mxu0 %v2981_v5  ;;  %1305 = vmatpush1.msra.mxu0 %v1184_v57 }
  0x43   : > { %1306 = vmatprep.subr.mxu0 %v2981_v5 }
  0x44   : > { %1307 = vmatpush1.msra.mxu0 %v1183_v59 }
  0x45   : > { %2435 = vmatmul.mubr.msk.f32.gmra.mxu0 %vm407_vm1, %v838_v54  ;;  %1308 = vmatprep.subr.mxu0 %v2981_v5 }
  0x46   : > { %940 = vmatprep.mubr.f32.mxu0 %v2981_v5  ;;  %1309 = vmatpush1.msra.mxu0 %v1182_v61 }
  0x47   : > { %1310 = vmatprep.subr.mxu0 %v2981_v5 }
  0x48   : > { %1311 = vmatpush1.msra.mxu0 %v1181_v62 }
  0x49   : > { %2436 = vmatmul.mubr.msk.f32.gmra.mxu0 %vm407_vm1, %v839_v55  ;;  %1312 = vmatprep.subr.mxu0 %v2981_v5 }
  0xdd   : > { %v490_v63 = vpop.f32.mrf.mxu0 }
  0xdf   : > { %v492_v0 = vpop.f32.mrf.mxu0 }
  0xe1   : > { %v496_v1 = vpop.f32.mrf.mxu0 }
  0xe3   : > { %v498_v2 = vpop.f32.mrf.mxu0 }
  0xe5   : > { %v502_v3 = vpop.f32.mrf.mxu0 }
  0xe7   : > { %v504_v4 = vpop.f32.mrf.mxu0  ;;  %v814_v12 = vpop.f32.mrf.mxu1 }
  0xe9   : > { %v588_v6 = vpop.f32.mrf.mxu0  ;;  %v816_v16 = vpop.f32.mrf.mxu1 }
  0xea   : > { %v589_v19 = vadd.f32 %v588_v6, %v490_v63  ;;  %v1180_v6 = vld [vmem:[%s4209_s3 + $0x58] sm:$0xff] }
  0xeb   : > { %v590_v7 = vpop.f32.mrf.mxu0  ;;  %v820_v21 = vpop.f32.mrf.mxu1  ;;  %1313 = vmatpush1.msra.mxu0 %v1180_v6  ;;  %v1170_v6 = vld [vmem:[%s4209_s3 + $0x8] sm:$0xff] }
  0xec   : > { %v591_v22 = vadd.f32 %v590_v7, %v492_v0  ;;  %1314 = vmatprep.subr.mxu0 %v2981_v5 }
  0xed   : > { %v594_v8 = vpop.f32.mrf.mxu0  ;;  %v822_v31 = vpop.f32.mrf.mxu1 }
  0xee   : > { %v595_v27 = vadd.f32 %v594_v8, %v496_v1 }
  0xef   : > { %v596_v9 = vpop.f32.mrf.mxu0  ;;  %v826_v43 = vpop.f32.mrf.mxu1 }
  0xf0   : > { %v597_v30 = vadd.f32 %v596_v9, %v498_v2 }
  0xf1   : > { %v600_v10 = vpop.f32.mrf.mxu0  ;;  %v828_v55 = vpop.f32.mrf.mxu1 }
  0xf2   : > { %v601_v38 = vadd.f32 %v600_v10, %v502_v3  ;;  %v2448_v3 = vld [vmem:[%s4209_s3 + $0xe8] sm:$0xff]  ;;  %v2447_v10 = vld [vmem:[%s4209_s3 + $0xe0] sm:$0xff] }
  0xf3   : > { %v602_v11 = vpop.f32.mrf.mxu0  ;;  %1237 = vmatpush1.msra.mxu1 %v2448_v3  ;;  %v1171_v3 = vld [vmem:[%s4209_s3 + $0x10] sm:$0xff] }
  0xf4   : > { %v603_v42 = vadd.f32 %v602_v11, %v504_v4  ;;  %1238 = vmatprep.subr.mxu1 %v2981_v5  ;;  %v1179_v11 = vld [vmem:[%s4209_s3 + $0x50] sm:$0xff] }
  0xf5   : > { %v698_v14 = vpop.f32.mrf.mxu0  ;;  %1239 = vmatpush1.msra.mxu1 %v2447_v10  ;;  %1315 = vmatpush1.msra.mxu0 %v1179_v11  ;;  %v1186_v10 = vld [vmem:[%s4209_s3 + $0x88] sm:$0x7f]  ;;  %v2453_v11 = vld [vmem:[%s4209_s3 + $0x110] sm:$0xff] }
  0xf6   : > { %v715_v23 = vadd.f32 %v698_v14, %v589_v19  ;;  %1240 = vmatprep.subr.mxu1 %v2981_v5  ;;  %1316 = vmatprep.subr.mxu0 %v2981_v5 }
  0xf7   : > { %v700_v15 = vpop.f32.mrf.mxu0 }
  0xf8   : > { %v716_v28 = vadd.f32 %v700_v15, %v591_v22  ;;  %v831_v33 = vadd.f32 %v814_v12, %v715_v23  ;;  %v2446_v15 = vld [vmem:[%s4209_s3 + $0xd8] sm:$0xff] }
  0xf9   : > { %v704_v18 = vpop.f32.mrf.mxu0  ;;  %1241 = vmatpush1.msra.mxu1 %v2446_v15 }
  0xfa   : > { %v717_v34 = vadd.f32 %v704_v18, %v595_v27  ;;  %v832_v39 = vadd.f32 %v816_v16, %v716_v28  ;;  %v1178_v16 = vld [vmem:[%s4209_s3 + $0x48] sm:$0xff]  ;;  %1242 = vmatprep.subr.mxu1 %v2981_v5  ;;  %v2445_v18 = vld [vmem:[%s4209_s3 + $0xd0] sm:$0xff] }
  0xfb   : > { %v706_v20 = vpop.f32.mrf.mxu0  ;;  %1317 = vmatpush1.msra.mxu0 %v1178_v16  ;;  %1243 = vmatpush1.msra.mxu1 %v2445_v18 }
  0xfc   : > { %v718_v36 = vadd.f32 %v706_v20, %v597_v30  ;;  %v833_v45 = vadd.f32 %v820_v21, %v717_v34  ;;  %1318 = vmatprep.subr.mxu0 %v2981_v5  ;;  %1244 = vmatprep.subr.mxu1 %v2981_v5 }
  0xfd   : > { %v710_v25 = vpop.f32.mrf.mxu0 }
  0xfe   : > { %v719_v46 = vadd.f32 %v710_v25, %v601_v38  ;;  %v834_v49 = vadd.f32 %v822_v31, %v718_v36 }
  0xff   : > { %v712_v32 = vpop.f32.mrf.mxu0 }
 0x100   : > { %v720_v51 = vadd.f32 %v712_v32, %v603_v42  ;;  %v835_v57 = vadd.f32 %v826_v43, %v719_v46  ;;  %v2444_v42 = vld [vmem:[%s4209_s3 + $0xc8] sm:$0xff]  ;;  %v1176_v43 = vld [vmem:[%s4209_s3 + $0x38] sm:$0xff]  ;;  %v2443_v46 = vld [vmem:[%s4209_s3 + $0xc0] sm:$0xff] }
 0x101   : > { %v930_v37 = vpop.f32.mrf.mxu0  ;;  %1245 = vmatpush1.msra.mxu1 %v2444_v42 }
 0x102   : > { %v947_v40 = vadd.f32 %v930_v37, %v831_v33  ;;  %v836_v63 = vadd.f32 %v828_v55, %v720_v51  ;;  %1246 = vmatprep.subr.mxu1 %v2981_v5  ;;  %v1175_v51 = vld [vmem:[%s4209_s3 + $0x30] sm:$0xff] }
 0x103   : > { %v932_v44 = vpop.f32.mrf.mxu0  ;;  %1247 = vmatpush1.msra.mxu1 %v2443_v46 }
 0x104   : > { %v965_v47 = vadd.f32 %v958_v35, %v947_v40  ;;  %v948_v48 = vadd.f32 %v932_v44, %v832_v39  ;;  %1248 = vmatprep.subr.mxu1 %v2981_v5 }
 0x105   : > { %v936_v50 = vpop.f32.mrf.mxu0 }
 0x106   : > { %v971_v52 = vmax.f32 %v965_v47, 0.0  ;;  %v966_v53 = vadd.f32 %v962_v41, %v948_v48  ;;  %v949_v54 = vadd.f32 %v936_v50, %v833_v45 }
 0x107   : > { %v938_v56 = vpop.f32.mrf.mxu0 }
 0x108   : > { %977 = vst [vmem:[#allocation2] sm:$0xff] %v971_v52  ;;  %v972_v58 = vmax.f32 %v966_v53, 0.0  ;;  %v967_v59 = vadd.f32 %v958_v35, %v949_v54  ;;  %v950_v60 = vadd.f32 %v938_v56, %v834_v49  ;;  %v2442_v52 = vld [vmem:[%s4209_s3 + $0xb8] sm:$0xff] }
 0x109   : > { %v942_v61 = vpop.f32.mrf.mxu0  ;;  %1249 = vmatpush1.msra.mxu1 %v2442_v52 }
 0x10a   : > { %979 = vst.msk [vmem:[#allocation2 + $0x8] sm:$0xff] %vm978_vm2, %v972_v58  ;;  %v973_v0 = vmax.f32 %v967_v59, 0.0  ;;  %v968_v1 = vadd.f32 %v962_v41, %v950_v60  ;;  %v951_v2 = vadd.f32 %v942_v61, %v835_v57  ;;  %v1174_v57 = vld [vmem:[%s4209_s3 + $0x28] sm:$0xff]  ;;  %v2441_v58 = vld [vmem:[%s4209_s3 + $0xb0] sm:$0xff]  ;;  %1250 = vmatprep.subr.mxu1 %v2981_v5  ;;  %v1173_v61 = vld [vmem:[%s4209_s3 + $0x20] sm:$0xff] }
 0x10b   : > { %v944_v4 = vpop.f32.mrf.mxu0  ;;  %1251 = vmatpush1.msra.mxu1 %v2441_v58 }
 0x10c   : > { %980 = vst [vmem:[#allocation2 + $0x10] sm:$0xff] %v973_v0  ;;  %v974_v7 = vmax.f32 %v968_v1, 0.0  ;;  %v969_v8 = vadd.f32 %v958_v35, %v951_v2  ;;  %v952_v9 = vadd.f32 %v944_v4, %v836_v63  ;;  %v2440_v63 = vld [vmem:[%s4209_s3 + $0xa8] sm:$0xff]  ;;  %1252 = vmatprep.subr.mxu1 %v2981_v5  ;;  %v1172_v1 = vld [vmem:[%s4209_s3 + $0x18] sm:$0xff]  ;;  %v2439_v2 = vld [vmem:[%s4209_s3 + $0xa0] sm:$0xff] }
 0x10d   : > { %1253 = vmatpush1.msra.mxu1 %v2440_v63  ;;  %v2438_v4 = vld [vmem:[%s4209_s3 + $0x98] sm:$0xff] }
 0x10e   : > { %981 = vst.msk [vmem:[#allocation2 + $0x18] sm:$0xff] %vm978_vm2, %v974_v7  ;;  %v975_v12 = vmax.f32 %v969_v8, 0.0  ;;  %v970_v14 = vadd.f32 %v962_v41, %v952_v9  ;;  %v1177_v41 = vld [vmem:[%s4209_s3 + $0x40] sm:$0xff]  ;;  %1254 = vmatprep.subr.mxu1 %v2981_v5  ;;  %v2437_v7 = vld [vmem:[%s4209_s3 + $0x90] sm:$0xff]  ;;  %v2454_v9 = vld [vmem:[%s4209_s3 + $0x118] sm:$0x7f] }
 0x10f   : > { %1319 = vmatpush1.msra.mxu0 %v1177_v41  ;;  %1255 = vmatpush1.msra.mxu1 %v2439_v2  ;;  %v1169_v8 = vld [vmem:[%s4209_s3] sm:$0xff] }
 0x110   : > { %982 = vst [vmem:[#allocation2 + $0x20] sm:$0xff] %v975_v12  ;;  %v976_v17 = vmax.f32 %v970_v14, 0.0  ;;  %1320 = vmatprep.subr.mxu0 %v2981_v5  ;;  %1256 = vmatprep.subr.mxu1 %v2981_v5  ;;  %v1185_v12 = vld [vmem:[%s4209_s3 + $0x80] sm:$0xff] }
 0x111   : > { %v1033_v19 = vld [vmem:[#allocation2 + $0x6] ss:$8 sm:$0x3]  ;;  %v1035_v20 = vld [vmem:[#allocation2 + $0x7] ss:$8 sm:$0x3]  ;;  %1321 = vmatpush1.msra.mxu0 %v1176_v43  ;;  %1257 = vmatpush1.msra.mxu1 %v2438_v4 }
 0x112   : > { %983 = vst.msk [vmem:[#allocation2 + $0x28] sm:$0xff] %vm978_vm2, %v976_v17  ;;  %v3343_v21 = vmax.f32 %v1033_v19, %v1035_v20  ;;  %v1003_v22 = vld [vmem:[#allocation2 + $0x2] ss:$8 sm:$0x3]  ;;  %1322 = vmatprep.subr.mxu0 %v2981_v5  ;;  %1258 = vmatprep.subr.mxu1 %v2981_v5 }
 0x113   : > { %v1005_v23 = vld [vmem:[#allocation2 + $0x3] ss:$8 sm:$0x3]  ;;  %v1018_v25 = vld [vmem:[#allocation2 + $0x4] ss:$8 sm:$0x3]  ;;  %1323 = vmatpush1.msra.mxu0 %v1175_v51  ;;  %1259 = vmatpush1.msra.mxu1 %v2437_v7 }
 0x114   : > { %v3346_v24 = vmax.f32 %v1003_v22, %v1005_v23  ;;  %1038 = vrot.lane.b32.xlu1 %v3343_v21, %s2982_s14  ;;  %v1020_v26 = vld [vmem:[#allocation2 + $0x5] ss:$8 sm:$0x3]  ;;  %v984_v45 = vld [vmem:[#allocation2] ss:$8 sm:$0x3]  ;;  %1324 = vmatprep.subr.mxu0 %v2981_v5 }
 0x115   : > { %v1048_v27 = vld [vmem:[#allocation2 + $0x10] ss:$8 sm:$0x3]  ;;  %v1050_v28 = vld [vmem:[#allocation2 + $0x11] ss:$8 sm:$0x3]  ;;  %v3354_v30 = vmax.f32 %v1018_v25, %v1020_v26  ;;  %1325 = vmatpush1.msra.mxu0 %v1174_v57  ;;  %1288 = vmatprep.subr.mxu1 %v2981_v5 }
 0x116   : > { %1008 = vrot.lane.b32.xlu0 %v3346_v24, %s2982_s14  ;;  %v3352_v29 = vmax.f32 %v1048_v27, %v1050_v28  ;;  %v1078_v31 = vld [vmem:[#allocation2 + $0x14] ss:$8 sm:$0x3]  ;;  %v1080_v32 = vld [vmem:[#allocation2 + $0x15] ss:$8 sm:$0x3]  ;;  %1326 = vmatprep.subr.mxu0 %v2981_v5 }
 0x117   : > { %v1063_v33 = vld [vmem:[#allocation2 + $0x12] ss:$8 sm:$0x3]  ;;  %v1065_v34 = vld [vmem:[#allocation2 + $0x13] ss:$8 sm:$0x3]  ;;  %v3360_v35 = vmax.f32 %v1078_v31, %v1080_v32  ;;  %1327 = vmatpush1.msra.mxu0 %v1173_v61  ;;  %2455 = vmatpush2.msk.msra.mxu1 %vm1214_vm3, %v2454_v9 }
 0x118   : > { %1053 = vrot.lane.b32.xlu1 %v3352_v29, %s2982_s14  ;;  %v3362_v36 = vmax.f32 %v1063_v33, %v1065_v34  ;;  %v1093_v39 = vld [vmem:[#allocation2 + $0x16] ss:$8 sm:$0x3]  ;;  %v1095_v40 = vld [vmem:[#allocation2 + $0x17] ss:$8 sm:$0x3]  ;;  %1328 = vmatprep.subr.mxu0 %v2981_v5 }
 0x119   : > { %v1108_v37 = vld [vmem:[#allocation2 + $0x20] ss:$8 sm:$0x3]  ;;  %v1110_v38 = vld [vmem:[#allocation2 + $0x21] ss:$8 sm:$0x3]  ;;  %v3382_v47 = vmax.f32 %v1093_v39, %v1095_v40  ;;  %1329 = vmatpush1.msra.mxu0 %v1172_v1  ;;  %1290 = vmatprep.subr.mxu1 %v2981_v5 }
 0x11a   : > { %1023 = vrot.lane.b32.xlu0 %v3354_v30, %s2982_s14  ;;  %v3377_v44 = vmax.f32 %v1108_v37, %v1110_v38  ;;  %v1123_v48 = vld [vmem:[#allocation2 + $0x22] ss:$8 sm:$0x3]  ;;  %v986_v49 = vld [vmem:[#allocation2 + $0x1] ss:$8 sm:$0x3]  ;;  %1330 = vmatprep.subr.mxu0 %v2981_v5 }
 0x11b   : > { %v1125_v50 = vld [vmem:[#allocation2 + $0x23] ss:$8 sm:$0x3]  ;;  %v3396_v53 = vmax.f32 %v984_v45, %v986_v49  ;;  %v1153_v54 = vld [vmem:[#allocation2 + $0x26] ss:$8 sm:$0x3]  ;;  %1331 = vmatpush1.msra.mxu0 %v1171_v3  ;;  %1291 = vmatpush2.msra.mxu1 %v2453_v11 }
 0x11c   : > { %1083 = vrot.lane.b32.xlu1 %v3360_v35, %s2982_s14  ;;  %v3400_v55 = vmax.f32 %v1123_v48, %v1125_v50  ;;  %v1155_v56 = vld [vmem:[#allocation2 + $0x27] ss:$8 sm:$0x3]  ;;  %v1138_v59 = vld [vmem:[#allocation2 + $0x24] ss:$8 sm:$0x3]  ;;  %1332 = vmatprep.subr.mxu0 %v2981_v5 }
 0x11d   : > { %v1140_v60 = vld [vmem:[#allocation2 + $0x25] ss:$8 sm:$0x3]  ;;  %v3417_v62 = vmax.f32 %v1153_v54, %v1155_v56  ;;  %1333 = vmatpush1.msra.mxu0 %v1170_v6  ;;  %1414 = vmatprep.subr.mxu1 %v2981_v5 }
 0x11e   : > { %1068 = vrot.lane.b32.xlu0 %v3362_v36, %s2982_s14  ;;  %v3422_v0 = vmax.f32 %v1138_v59, %v1140_v60  ;;  %1334 = vmatprep.subr.mxu0 %v2981_v5 }
 0x11f   : > { %1335 = vmatpush1.msra.mxu0 %v1169_v8 }
 0x120   : > { %1113 = vrot.lane.b32.xlu1 %v3377_v44, %s2982_s14  ;;  %1364 = vmatprep.subr.mxu0 %v2981_v5 }
 0x121   : > { %2457 = vmatpush2.msk.msra.mxu0 %vm1214_vm3, %v1186_v10 }
 0x122   : > { %1098 = vrot.lane.b32.xlu0 %v3382_v47, %s2982_s14  ;;  %1366 = vmatprep.subr.mxu0 %v2981_v5 }
 0x123   : > { %1367 = vmatpush2.msra.mxu0 %v1185_v12 }
 0x124   : > { %989 = vrot.lane.b32.xlu1 %v3396_v53, %s2982_s14  ;;  %1525 = vmatprep.subr.mxu0 %v2981_v5 }
 0x126   : > { %1128 = vrot.lane.b32.xlu0 %v3400_v55, %s2982_s14 }
 0x128   : > { %1158 = vrot.lane.b32.xlu1 %v3417_v62, %s2982_s14 }
 0x12a   : > { %1143 = vrot.lane.b32.xlu0 %v3422_v0, %s2982_s14 }
 0x186   : > { %v1039_v14 = vpop.permute.xlu1 %1038 }
 0x187   : > { %v1040_v15 = vrot.slane %v1039_v14, 1 }
 0x188   : > { %v1009_v16 = vpop.permute.xlu0 %1008 }
 0x189   : > { %v1010_v17 = vrot.slane %v1009_v16, 1  ;;  %v1041_v19 = vsel %vm992_vm4, %v1039_v14, %v1040_v15  ;;  %v2494_v14 = vld [vmem:[%s4209_s3 + $0x228] sm:$0xff] }
 0x18a   : > { %v1043_v20 = vmax.f32 %v3343_v21, %v1041_v19  ;;  %v1054_v23 = vpop.permute.xlu1 %1053  ;;  %v2493_v19 = vld [vmem:[%s4209_s3 + $0x220] sm:$0xff] }
 0x18b   : > { %v1011_v22 = vsel %vm992_vm4, %v1009_v16, %v1010_v17  ;;  %v1055_v26 = vrot.slane %v1054_v23, 1  ;;  %v2473_v16 = vld [vmem:[%s4209_s3 + $0x190] sm:$0xff] }
 0x18c   : > { %v1013_v25 = vmax.f32 %v3346_v24, %v1011_v22  ;;  %v1024_v27 = vpop.permute.xlu0 %1023  ;;  %1045 = vst.msk [vmem:[#allocation3 + $0x3] ss:$8 sm:$0x3] %vm3479_vm5, %v1043_v20 }
 0x18d   : > { %v1025_v28 = vrot.slane %v1024_v27, 1  ;;  %v1056_v13 = vsel %vm992_vm4, %v1054_v23, %v1055_v26  ;;  %v2472_v23 = vld [vmem:[%s4209_s3 + $0x188] sm:$0xff] }
 0x18e   : > { %1015 = vst.msk [vmem:[#allocation3 + $0x1] ss:$8 sm:$0x3] %vm3479_vm5, %v1013_v25  ;;  %v1058_v31 = vmax.f32 %v3352_v29, %v1056_v13  ;;  %v1084_v32 = vpop.permute.xlu1 %1083  ;;  %v2492_v25 = vld [vmem:[%s4209_s3 + $0x218] sm:$0xff] }
 0x18f   : > { %v1026_v21 = vsel %vm992_vm4, %v1024_v27, %v1025_v28  ;;  %v1085_v34 = vrot.slane %v1084_v32, 1  ;;  %v2471_v27 = vld [vmem:[%s4209_s3 + $0x180] sm:$0xff] }
 0x190   : > { %v1028_v33 = vmax.f32 %v3354_v30, %v1026_v21  ;;  %v1069_v24 = vpop.permute.xlu0 %1068  ;;  %1060 = vst.msk [vmem:[#allocation3 + $0x4] ss:$8 sm:$0x3] %vm3479_vm5, %v1058_v31  ;;  %v2491_v31 = vld [vmem:[%s4209_s3 + $0x210] sm:$0xff] }
 0x191   : > { %v1070_v37 = vrot.slane %v1069_v24, 1  ;;  %v1086_v38 = vsel %vm992_vm4, %v1084_v32, %v1085_v34  ;;  %v2470_v32 = vld [vmem:[%s4209_s3 + $0x178] sm:$0xff]  ;;  %v2469_v34 = vld [vmem:[%s4209_s3 + $0x170] sm:$0xff] }
 0x192   : > { %1030 = vst.msk [vmem:[#allocation3 + $0x2] ss:$8 sm:$0x3] %vm3479_vm5, %v1028_v33  ;;  %v1088_v39 = vmax.f32 %v3360_v35, %v1086_v38  ;;  %v1114_v40 = vpop.permute.xlu1 %1113  ;;  %v2490_v33 = vld [vmem:[%s4209_s3 + $0x208] sm:$0xff]  ;;  %v2488_v38 = vld [vmem:[%s4209_s3 + $0x1f8] sm:$0xff] }
 0x193   : > { %v1071_v29 = vsel %vm992_vm4, %v1069_v24, %v1070_v37  ;;  %v1115_v42 = vrot.slane %v1114_v40, 1  ;;  %v2489_v24 = vld [vmem:[%s4209_s3 + $0x200] sm:$0xff]  ;;  %v2468_v37 = vld [vmem:[%s4209_s3 + $0x168] sm:$0xff] }
 0x194   : > { %v1073_v41 = vmax.f32 %v3362_v36, %v1071_v29  ;;  %v1099_v30 = vpop.permute.xlu0 %1098  ;;  %1090 = vst.msk [vmem:[#allocation3 + $0x6] ss:$8 sm:$0x3] %vm3479_vm5, %v1088_v39  ;;  %v2467_v39 = vld [vmem:[%s4209_s3 + $0x160] sm:$0xff]  ;;  %v2487_v29 = vld [vmem:[%s4209_s3 + $0x1f0] sm:$0xff] }
 0x195   : > { %v1100_v43 = vrot.slane %v1099_v30, 1  ;;  %v1116_v45 = vsel %vm992_vm4, %v1114_v40, %v1115_v42  ;;  %v2466_v40 = vld [vmem:[%s4209_s3 + $0x158] sm:$0xff]  ;;  %v2465_v42 = vld [vmem:[%s4209_s3 + $0x150] sm:$0xff] }
 0x196   : > { %1075 = vst.msk [vmem:[#allocation3 + $0x5] ss:$8 sm:$0x3] %vm3479_vm5, %v1073_v41  ;;  %v1118_v46 = vmax.f32 %v3377_v44, %v1116_v45  ;;  %v990_v48 = vpop.permute.xlu1 %989  ;;  %v2486_v41 = vld [vmem:[%s4209_s3 + $0x1e8] sm:$0xff]  ;;  %v2484_v45 = vld [vmem:[%s4209_s3 + $0x1d8] sm:$0xff] }
 0x197   : > { %v1101_v35 = vsel %vm992_vm4, %v1099_v30, %v1100_v43  ;;  %v991_v36 = vrot.slane %v990_v48, 1  ;;  %v2485_v30 = vld [vmem:[%s4209_s3 + $0x1e0] sm:$0xff]  ;;  %v2464_v43 = vld [vmem:[%s4209_s3 + $0x148] sm:$0xff] }
 0x198   : > { %v1103_v49 = vmax.f32 %v3382_v47, %v1101_v35  ;;  %v1129_v50 = vpop.permute.xlu0 %1128  ;;  %1120 = vst.msk [vmem:[#allocation3 + $0x10] ss:$8 sm:$0x3] %vm3479_vm5, %v1118_v46  ;;  %v2463_v46 = vld [vmem:[%s4209_s3 + $0x140] sm:$0xff]  ;;  %v2483_v35 = vld [vmem:[%s4209_s3 + $0x1d0] sm:$0xff] }
 0x199   : > { %v1130_v51 = vrot.slane %v1129_v50, 1  ;;  %v993_v52 = vsel %vm992_vm4, %v990_v48, %v991_v36  ;;  %v2462_v48 = vld [vmem:[%s4209_s3 + $0x138] sm:$0xff]  ;;  %v2481_v36 = vld [vmem:[%s4209_s3 + $0x1c0] sm:$0xff] }
 0x19a   : > { %1105 = vst.msk [vmem:[#allocation3 + $0x7] ss:$8 sm:$0x3] %vm3479_vm5, %v1103_v49  ;;  %v995_v44 = vmax.f32 %v3396_v53, %v993_v52  ;;  %v1159_v56 = vpop.permute.xlu1 %1158  ;;  %v2482_v49 = vld [vmem:[%s4209_s3 + $0x1c8] sm:$0xff]  ;;  %v2480_v52 = vld [vmem:[%s4209_s3 + $0x1b8] sm:$0xff] }
 0x19b   : > { %v1131_v54 = vsel %vm992_vm4, %v1129_v50, %v1130_v51  ;;  %v1160_v47 = vrot.slane %v1159_v56, 1  ;;  %v2461_v50 = vld [vmem:[%s4209_s3 + $0x130] sm:$0xff]  ;;  %v2460_v51 = vld [vmem:[%s4209_s3 + $0x128] sm:$0xff] }
 0x19c   : > { %v1133_v57 = vmax.f32 %v3400_v55, %v1131_v54  ;;  %v1144_v58 = vpop.permute.xlu0 %1143  ;;  %1000 = vst.msk [vmem:[#allocation3] ss:$8 sm:$0x3] %vm3479_vm5, %v995_v44  ;;  %v2459_v54 = vld [vmem:[%s4209_s3 + $0x120] sm:$0xff] }
 0x19d   : > { %v1145_v59 = vrot.slane %v1144_v58, 1  ;;  %v1161_v60 = vsel %vm992_vm4, %v1159_v56, %v1160_v47  ;;  %v2479_v56 = vld [vmem:[%s4209_s3 + $0x1b0] sm:$0xff] }
 0x19e   : > { %1135 = vst.msk [vmem:[#allocation3 + $0x11] ss:$8 sm:$0x3] %vm3479_vm5, %v1133_v57  ;;  %v1163_v63 = vmax.f32 %v3417_v62, %v1161_v60  ;;  %v2474_v62 = vld [vmem:[%s4209_s3 + $0x198] sm:$0xff]  ;;  %v2476_v57 = vld [vmem:[%s4209_s3 + $0x1a8] sm:$0x7f] }
 0x19f   : > { %v1146_v61 = vsel %vm992_vm4, %v1144_v58, %v1145_v59  ;;  %v1190_v1 = vld [vmem:[#allocation3 + $0x18] sm:$0x1]  ;;  %v1189_v2 = vld [vmem:[#allocation3 + $0x10] sm:$0x1] }
 0x1a0   : > { %v1148_v53 = vmax.f32 %v3422_v0, %v1146_v61  ;;  %1165 = vst.msk [vmem:[#allocation3 + $0x13] ss:$8 sm:$0x3] %vm3479_vm5, %v1163_v63  ;;  %v1219_v3 = vrot.slane %v1190_v1, 1  ;;  %v1216_v6 = vrot.slane %v1189_v2, 1  ;;  %v2475_v63 = vld [vmem:[%s4209_s3 + $0x1a0] sm:$0xff] }
 0x1a1   : > { %v1188_v55 = vld [vmem:[#allocation3 + $0x8] sm:$0xfe]  ;;  %v1187_v4 = vld [vmem:[#allocation3] sm:$0xfe] }
 0x1a2   : > { %1150 = vst.msk [vmem:[#allocation3 + $0x12] ss:$8 sm:$0x3] %vm3479_vm5, %v1148_v53  ;;  %v1218_v7 = vrot.slane %v1188_v55, 1  ;;  %v1215_v8 = vrot.slane %v1187_v4, 1 }
 0x1a3   : > { %v1375_v0 = vld [vmem:[#allocation3 + $0x8] sm:$0xfc]  ;;  %v1167_v12 = vld [vmem:[#allocation3] sm:$0xff] }
 0x1a4   : > { %v1220_v9 = vsel %vm1214_vm3, %v1218_v7, %v1219_v3  ;;  %v1217_v10 = vsel %vm1214_vm3, %v1215_v8, %v1216_v6  ;;  %v1168_v11 = vld [vmem:[#allocation3 + $0x8] sm:$0xff]  ;;  %v1405_v17 = vrot.slane %v1375_v0, 2  ;;  %v1374_v58 = vld [vmem:[#allocation3] sm:$0xfc] }
 0x1a5   : > { %2456 = vmatprep.mubr.msk.f32.mxu1 %vm1222_vm6, %v1220_v9  ;;  %2458 = vmatprep.mubr.msk.f32.mxu0 %vm1222_vm6, %v1168_v11  ;;  %v1377_v15 = vld [vmem:[#allocation3 + $0x18] sm:$0x3]  ;;  %v1486_v20 = vld [vmem:[#allocation3 + $0x8] sm:$0xf8]  ;;  %v1376_v44 = vld [vmem:[#allocation3 + $0x10] sm:$0x3] }
 0x1a6   : > { %1293 = vmatmul.mubr.f32.vlgmr.msra.gmra.mxu1 %v1217_v10  ;;  %1369 = vmatmul.mubr.f32.vlgmr.msra.gmra.mxu0 %v1167_v12  ;;  %v1406_v18 = vrot.slane %v1377_v15, 2  ;;  %v1516_v28 = vrot.slane %v1486_v20, 3  ;;  %v1403_v59 = vrot.slane %v1376_v44, 2  ;;  %v2496_v61 = vld [vmem:[%s4209_s3 + $0x238] sm:$0x7f]  ;;  %v1402_v1 = vrot.slane %v1374_v58, 2 }
 0x1a7   : > { %1415 = vmatpush1.msra.mxu1 %v2474_v62  ;;  %1526 = vmatpush1.msra.mxu0 %v2494_v14  ;;  %v1485_v53 = vld [vmem:[#allocation3] sm:$0xf8]  ;;  %v1597_v55 = vld [vmem:[#allocation3 + $0x8] sm:$0xf0]  ;;  %v2512_v11 = vld [vmem:[%s4209_s3 + $0x2a8] sm:$0xff] }
 0x1a8   : > { %1416 = vmatprep.subr.mxu1 %v2981_v5  ;;  %1527 = vmatprep.subr.mxu0 %v2981_v5  ;;  %v1407_v22 = vsel %vm1401_vm7, %v1405_v17, %v1406_v18  ;;  %v2495_v3 = vld [vmem:[%s4209_s3 + $0x230] sm:$0xff]  ;;  %v1404_v6 = vsel %vm1401_vm7, %v1402_v1, %v1403_v59  ;;  %v1513_v7 = vrot.slane %v1485_v53, 3  ;;  %v2514_v8 = vld [vmem:[%s4209_s3 + $0x2b8] sm:$0xff]  ;;  %v1626_v62 = vrot.slane %v1597_v55, 4  ;;  %v2511_v12 = vld [vmem:[%s4209_s3 + $0x2a0] sm:$0xff] }
 0x1a9   : > { %1417 = vmatpush1.msra.mxu1 %v2473_v16  ;;  %2478 = vmatprep.mubr.msk.f32.mxu1 %vm1222_vm6, %v1407_v22  ;;  %v1488_v26 = vld [vmem:[#allocation3 + $0x18] sm:$0x7]  ;;  %v1487_v47 = vld [vmem:[#allocation3 + $0x10] sm:$0x7]  ;;  %v2513_v9 = vld [vmem:[%s4209_s3 + $0x2b0] sm:$0xff] }
 0x1aa   : > { %1418 = vmatprep.subr.mxu1 %v2981_v5  ;;  %1528 = vmatpush1.msra.mxu0 %v2493_v19  ;;  %v1517_v13 = vrot.slane %v1488_v26, 3  ;;  %v1599_v60 = vld [vmem:[#allocation3 + $0x18] sm:$0xf]  ;;  %v1514_v2 = vrot.slane %v1487_v47, 3  ;;  %v2510_v14 = vld [vmem:[%s4209_s3 + $0x298] sm:$0xff]  ;;  %v2509_v15 = vld [vmem:[%s4209_s3 + $0x290] sm:$0xff] }
 0x1ab   : > { %1419 = vmatpush1.msra.mxu1 %v2472_v23  ;;  %1529 = vmatprep.subr.mxu0 %v2981_v5  ;;  %v1627_v4 = vrot.slane %v1599_v60, 4  ;;  %v2508_v16 = vld [vmem:[%s4209_s3 + $0x288] sm:$0xff]  ;;  %v2507_v17 = vld [vmem:[%s4209_s3 + $0x280] sm:$0xff]  ;;  %v2506_v18 = vld [vmem:[%s4209_s3 + $0x278] sm:$0xff] }
 0x1ac   : > { %1420 = vmatprep.subr.mxu1 %v2981_v5  ;;  %1530 = vmatpush1.msra.mxu0 %v2492_v25  ;;  %v1518_v21 = vsel %vm1512_vm8, %v1516_v28, %v1517_v13  ;;  %v1515_v0 = vsel %vm1512_vm8, %v1513_v7, %v1514_v2  ;;  %v2505_v19 = vld [vmem:[%s4209_s3 + $0x270] sm:$0xff]  ;;  %v2504_v20 = vld [vmem:[%s4209_s3 + $0x268] sm:$0xff]  ;;  %v2503_v22 = vld [vmem:[%s4209_s3 + $0x260] sm:$0xff] }
 0x1ad   : > { %1421 = vmatpush1.msra.mxu1 %v2471_v27  ;;  %1531 = vmatprep.subr.mxu0 %v2981_v5  ;;  %v1628_v10 = vsel %vm417_vm0, %v1626_v62, %v1627_v4  ;;  %v2502_v23 = vld [vmem:[%s4209_s3 + $0x258] sm:$0xff]  ;;  %v2501_v25 = vld [vmem:[%s4209_s3 + $0x250] sm:$0xff]  ;;  %v2500_v26 = vld [vmem:[%s4209_s3 + $0x248] sm:$0xff] }
 0x1ae   : > { %1422 = vmatprep.subr.mxu1 %v2981_v5  ;;  %1532 = vmatpush1.msra.mxu0 %v2491_v31  ;;  %v2499_v27 = vld [vmem:[%s4209_s3 + $0x240] sm:$0xff]  ;;  %v2516_v13 = vld [vmem:[%s4209_s3 + $0x2c8] sm:$0x7f]  ;;  %v1596_v31 = vld [vmem:[#allocation3] sm:$0xf0] }
 0x1af   : > { %2498 = vmatprep.mubr.msk.f32.mxu0 %vm1222_vm6, %v1518_v21  ;;  %1423 = vmatpush1.msra.mxu1 %v2470_v32  ;;  %v1598_v28 = vld [vmem:[#allocation3 + $0x10] sm:$0xf]  ;;  %v2525_v44 = vld [vmem:[%s4211_s5 + $0xa8] sm:$0xff]  ;;  %v2523_v47 = vld [vmem:[%s4211_s5 + $0x98] sm:$0xff] }
 0x1b0   : > { %1533 = vmatprep.subr.mxu0 %v2981_v5  ;;  %1424 = vmatprep.subr.mxu1 %v2981_v5  ;;  %v1624_v21 = vrot.slane %v1598_v28, 4  ;;  %v2515_v32 = vld [vmem:[%s4209_s3 + $0x2c0] sm:$0xff]  ;;  %v1727_v59 = vld [vmem:[%s4211_s5 + $0x18] sm:$0xff]  ;;  %v2522_v60 = vld [vmem:[%s4211_s5 + $0x90] sm:$0xff] }
 0x1b1   : > { %1534 = vmatpush1.msra.mxu0 %v2490_v33  ;;  %1425 = vmatpush1.msra.mxu1 %v2469_v34  ;;  %v1623_v33 = vrot.slane %v1596_v31, 4  ;;  %v1728_v58 = vld [vmem:[%s4211_s5 + $0x20] sm:$0xff]  ;;  %v1725_v53 = vld [vmem:[%s4211_s5 + $0x8] sm:$0xff] }
 0x1b2   : > { %1535 = vmatprep.subr.mxu0 %v2981_v5  ;;  %1426 = vmatprep.subr.mxu1 %v2981_v5 }
 0x1b3   : > { %1536 = vmatpush1.msra.mxu0 %v2489_v24  ;;  %1427 = vmatpush1.msra.mxu1 %v2468_v37  ;;  %v1625_v34 = vsel %vm417_vm0, %v1623_v33, %v1624_v21  ;;  %v2535_v24 = vld [vmem:[%s4211_s5 + $0xf8] sm:$0x7f] }
 0x1b4   : > { %1537 = vmatprep.subr.mxu0 %v2981_v5  ;;  %1428 = vmatprep.subr.mxu1 %v2981_v5  ;;  %v1739_v37 = vld [vmem:[%s4211_s5 + $0x78] sm:$0x7f] }
 0x1b5   : > { %1538 = vmatpush1.msra.mxu0 %v2488_v38  ;;  %1429 = vmatpush1.msra.mxu1 %v2467_v39  ;;  %v2534_v38 = vld [vmem:[%s4211_s5 + $0xf0] sm:$0xff] }
 0x1b6   : > { %1539 = vmatprep.subr.mxu0 %v2981_v5  ;;  %1430 = vmatprep.subr.mxu1 %v2981_v5  ;;  %v1738_v39 = vld [vmem:[%s4211_s5 + $0x70] sm:$0xff] }
 0x1b7   : > { %1540 = vmatpush1.msra.mxu0 %v2487_v29  ;;  %1431 = vmatpush1.msra.mxu1 %v2466_v40  ;;  %v2533_v29 = vld [vmem:[%s4211_s5 + $0xe8] sm:$0xff] }
 0x1b8   : > { %1541 = vmatprep.subr.mxu0 %v2981_v5  ;;  %1432 = vmatprep.subr.mxu1 %v2981_v5  ;;  %v1737_v40 = vld [vmem:[%s4211_s5 + $0x68] sm:$0xff] }
 0x1b9   : > { %1542 = vmatpush1.msra.mxu0 %v2486_v41  ;;  %1433 = vmatpush1.msra.mxu1 %v2465_v42  ;;  %v2532_v41 = vld [vmem:[%s4211_s5 + $0xe0] sm:$0xff] }
 0x1ba   : > { %1543 = vmatprep.subr.mxu0 %v2981_v5  ;;  %1434 = vmatprep.subr.mxu1 %v2981_v5  ;;  %v1736_v42 = vld [vmem:[%s4211_s5 + $0x60] sm:$0xff] }
 0x1bb   : > { %1544 = vmatpush1.msra.mxu0 %v2485_v30  ;;  %1435 = vmatpush1.msra.mxu1 %v2464_v43  ;;  %v2531_v30 = vld [vmem:[%s4211_s5 + $0xd8] sm:$0xff] }
 0x1bc   : > { %1545 = vmatprep.subr.mxu0 %v2981_v5  ;;  %1436 = vmatprep.subr.mxu1 %v2981_v5  ;;  %v1735_v43 = vld [vmem:[%s4211_s5 + $0x58] sm:$0xff] }
 0x1bd   : > { %1546 = vmatpush1.msra.mxu0 %v2484_v45  ;;  %1437 = vmatpush1.msra.mxu1 %v2463_v46  ;;  %v2530_v45 = vld [vmem:[%s4211_s5 + $0xd0] sm:$0xff] }
 0x1be   : > { %1547 = vmatprep.subr.mxu0 %v2981_v5  ;;  %1438 = vmatprep.subr.mxu1 %v2981_v5  ;;  %v1734_v46 = vld [vmem:[%s4211_s5 + $0x50] sm:$0xff] }
 0x1bf   : > { %1548 = vmatpush1.msra.mxu0 %v2483_v35  ;;  %1439 = vmatpush1.msra.mxu1 %v2462_v48  ;;  %v2529_v35 = vld [vmem:[%s4211_s5 + $0xc8] sm:$0xff] }
 0x1c0   : > { %1549 = vmatprep.subr.mxu0 %v2981_v5  ;;  %1440 = vmatprep.subr.mxu1 %v2981_v5  ;;  %v1733_v48 = vld [vmem:[%s4211_s5 + $0x48] sm:$0xff] }
 0x1c1   : > { %1550 = vmatpush1.msra.mxu0 %v2482_v49  ;;  %1441 = vmatpush1.msra.mxu1 %v2461_v50  ;;  %v2528_v49 = vld [vmem:[%s4211_s5 + $0xc0] sm:$0xff] }
 0x1c2   : > { %1551 = vmatprep.subr.mxu0 %v2981_v5  ;;  %1442 = vmatprep.subr.mxu1 %v2981_v5  ;;  %v1732_v50 = vld [vmem:[%s4211_s5 + $0x40] sm:$0xff] }
 0x1c3   : > { %1552 = vmatpush1.msra.mxu0 %v2481_v36  ;;  %1443 = vmatpush1.msra.mxu1 %v2460_v51  ;;  %v2527_v36 = vld [vmem:[%s4211_s5 + $0xb8] sm:$0xff] }
 0x1c4   : > { %1553 = vmatprep.subr.mxu0 %v2981_v5  ;;  %1444 = vmatprep.subr.mxu1 %v2981_v5  ;;  %v1731_v51 = vld [vmem:[%s4211_s5 + $0x38] sm:$0xff] }
 0x1c5   : > { %1554 = vmatpush1.msra.mxu0 %v2480_v52  ;;  %1445 = vmatpush1.msra.mxu1 %v2459_v54  ;;  %v2526_v52 = vld [vmem:[%s4211_s5 + $0xb0] sm:$0xff] }
 0x1c6   : > { %1555 = vmatprep.subr.mxu0 %v2981_v5  ;;  %1474 = vmatprep.subr.mxu1 %v2981_v5  ;;  %v1730_v54 = vld [vmem:[%s4211_s5 + $0x30] sm:$0xff] }
 0x1c7   : > { %1556 = vmatpush1.msra.mxu0 %v2479_v56  ;;  %2477 = vmatpush2.msk.msra.mxu1 %vm1214_vm3, %v2476_v57  ;;  %v1729_v56 = vld [vmem:[%s4211_s5 + $0x28] sm:$0xff]  ;;  %v2524_v57 = vld [vmem:[%s4211_s5 + $0xa0] sm:$0xff] }
 0x1c8   : > { %1585 = vmatprep.subr.mxu0 %v2981_v5  ;;  %1476 = vmatprep.subr.mxu1 %v2981_v5 }
 0x1c9   : > { %2497 = vmatpush2.msk.msra.mxu0 %vm1214_vm3, %v2496_v61  ;;  %1477 = vmatpush2.msra.mxu1 %v2475_v63  ;;  %v1726_v61 = vld [vmem:[%s4211_s5 + $0x10] sm:$0xff]  ;;  %v2521_v63 = vld [vmem:[%s4211_s5 + $0x88] sm:$0xff] }
 0x1ca   : > { %1587 = vmatprep.subr.mxu0 %v2981_v5  ;;  %1479 = vmatmul.mubr.f32.vlgmr.msra.gmra.mxu1 %v1404_v6 }
 0x1cb   : > { %1588 = vmatpush2.msra.mxu0 %v2495_v3  ;;  %1635 = vmatprep.subr.mxu1 %v2981_v5 }
 0x1cc   : > { %1590 = vmatmul.mubr.f32.vlgmr.msra.gmra.mxu0 %v1515_v0  ;;  %1636 = vmatpush1.msra.mxu1 %v2514_v8 }
 0x1cd   : > { %2518 = vmatprep.mubr.msk.f32.mxu1 %vm1222_vm6, %v1628_v10  ;;  %1637 = vmatprep.subr.mxu1 %v2981_v5 }
 0x1ce   : > { %1638 = vmatpush1.msra.mxu1 %v2513_v9  ;;  %2679 = vmatprep.subr.mxu0 %v2981_v5 }
 0x1cf   : > { %1639 = vmatprep.subr.mxu1 %v2981_v5  ;;  %2680 = vmatpush3.msk.msra.mxu0 %vm1214_vm3, %v2535_v24 }
 0x1d0   : > { %1640 = vmatpush1.msra.mxu1 %v2512_v11  ;;  %2681 = vmatprep.subr.mxu0 %v2981_v5  ;;  %v2519_v11 = vld [vmem:[%s4210_s4] ss:$0 sm:$0xff] }
 0x1d1   : > { %1641 = vmatprep.subr.mxu1 %v2981_v5  ;;  %2682 = vmatpush3.msra.mxu0 %v2534_v38 }
 0x1d2   : > { %1642 = vmatpush1.msra.mxu1 %v2511_v12  ;;  %2683 = vmatprep.subr.mxu0 %v2981_v5 }
 0x1d3   : > { %1643 = vmatprep.subr.mxu1 %v2981_v5  ;;  %2684 = vmatpush3.msra.mxu0 %v2533_v29  ;;  %v2554_v29 = vld [vmem:[%s4211_s5 + $0x170] sm:$0xff] }
 0x1d4   : > { %1644 = vmatpush1.msra.mxu1 %v2510_v14  ;;  %2685 = vmatprep.subr.mxu0 %v2981_v5 }
 0x1d5   : > { %1645 = vmatprep.subr.mxu1 %v2981_v5  ;;  %2686 = vmatpush3.msra.mxu0 %v2532_v41  ;;  %v2553_v41 = vld [vmem:[%s4211_s5 + $0x168] sm:$0xff] }
 0x1d6   : > { %1646 = vmatpush1.msra.mxu1 %v2509_v15  ;;  %2687 = vmatprep.subr.mxu0 %v2981_v5 }
 0x1d7   : > { %1647 = vmatprep.subr.mxu1 %v2981_v5  ;;  %2688 = vmatpush3.msra.mxu0 %v2531_v30  ;;  %v2552_v30 = vld [vmem:[%s4211_s5 + $0x160] sm:$0xff] }
 0x1d8   : > { %1648 = vmatpush1.msra.mxu1 %v2508_v16  ;;  %2689 = vmatprep.subr.mxu0 %v2981_v5 }
 0x1d9   : > { %1649 = vmatprep.subr.mxu1 %v2981_v5  ;;  %2690 = vmatpush3.msra.mxu0 %v2530_v45  ;;  %v2551_v45 = vld [vmem:[%s4211_s5 + $0x158] sm:$0xff] }
 0x1da   : > { %1650 = vmatpush1.msra.mxu1 %v2507_v17  ;;  %2691 = vmatprep.subr.mxu0 %v2981_v5  ;;  %v2520_v17 = vld [vmem:[%s4211_s5 + $0x80] sm:$0xff] }
 0x1db   : > { %1651 = vmatprep.subr.mxu1 %v2981_v5  ;;  %2692 = vmatpush3.msra.mxu0 %v2529_v35  ;;  %v2550_v35 = vld [vmem:[%s4211_s5 + $0x150] sm:$0xff] }
 0x1dc   : > { %1652 = vmatpush1.msra.mxu1 %v2506_v18  ;;  %2693 = vmatprep.subr.mxu0 %v2981_v5  ;;  %v1724_v18 = vld [vmem:[%s4211_s5] sm:$0xff] }
 0x1dd   : > { %1653 = vmatprep.subr.mxu1 %v2981_v5  ;;  %2694 = vmatpush3.msra.mxu0 %v2528_v49  ;;  %v2549_v49 = vld [vmem:[%s4211_s5 + $0x148] sm:$0xff] }
 0x1de   : > { %1654 = vmatpush1.msra.mxu1 %v2505_v19  ;;  %2695 = vmatprep.subr.mxu0 %v2981_v5 }
 0x1df   : > { %1655 = vmatprep.subr.mxu1 %v2981_v5  ;;  %2696 = vmatpush3.msra.mxu0 %v2527_v36  ;;  %v2548_v36 = vld [vmem:[%s4211_s5 + $0x140] sm:$0xff] }
 0x1e0   : > { %1656 = vmatpush1.msra.mxu1 %v2504_v20  ;;  %2697 = vmatprep.subr.mxu0 %v2981_v5 }
 0x1e1   : > { %1657 = vmatprep.subr.mxu1 %v2981_v5  ;;  %2698 = vmatpush3.msra.mxu0 %v2526_v52  ;;  %v2547_v52 = vld [vmem:[%s4211_s5 + $0x138] sm:$0xff] }
 0x1e2   : > { %1658 = vmatpush1.msra.mxu1 %v2503_v22  ;;  %2699 = vmatprep.subr.mxu0 %v2981_v5 }
 0x1e3   : > { %1659 = vmatprep.subr.mxu1 %v2981_v5  ;;  %2700 = vmatpush3.msra.mxu0 %v2525_v44  ;;  %v2546_v44 = vld [vmem:[%s4211_s5 + $0x130] sm:$0xff] }
 0x1e4   : > { %1660 = vmatpush1.msra.mxu1 %v2502_v23  ;;  %2701 = vmatprep.subr.mxu0 %v2981_v5 }
 0x1e5   : > { %1661 = vmatprep.subr.mxu1 %v2981_v5  ;;  %2702 = vmatpush3.msra.mxu0 %v2524_v57  ;;  %v2545_v57 = vld [vmem:[%s4211_s5 + $0x128] sm:$0xff] }
 0x1e6   : > { %1662 = vmatpush1.msra.mxu1 %v2501_v25  ;;  %2703 = vmatprep.subr.mxu0 %v2981_v5 }
 0x1e7   : > { %1663 = vmatprep.subr.mxu1 %v2981_v5  ;;  %2704 = vmatpush3.msra.mxu0 %v2523_v47  ;;  %v2544_v47 = vld [vmem:[%s4211_s5 + $0x120] sm:$0xff] }
 0x1e8   : > { %1664 = vmatpush1.msra.mxu1 %v2500_v26  ;;  %2705 = vmatprep.subr.mxu0 %v2981_v5 }
 0x1e9   : > { %1665 = vmatprep.subr.mxu1 %v2981_v5  ;;  %2706 = vmatpush3.msra.mxu0 %v2522_v60  ;;  %v2543_v60 = vld [vmem:[%s4211_s5 + $0x118] sm:$0xff] }
 0x1ea   : > { %1666 = vmatpush1.msra.mxu1 %v2499_v27  ;;  %2707 = vmatprep.subr.mxu0 %v2981_v5 }
 0x1eb   : > { %1695 = vmatprep.subr.mxu1 %v2981_v5  ;;  %2708 = vmatpush3.msra.mxu0 %v2521_v63  ;;  %v2542_v63 = vld [vmem:[%s4211_s5 + $0x110] sm:$0xff] }
 0x1ec   : > { %2517 = vmatpush2.msk.msra.mxu1 %vm1214_vm3, %v2516_v13  ;;  %2709 = vmatprep.subr.mxu0 %v2981_v5 }
 0x1ed   : > { %1697 = vmatprep.subr.mxu1 %v2981_v5  ;;  %2710 = vmatpush3.msra.mxu0 %v2520_v17  ;;  %v2129_v17 = vld [vmem:[%s4213_s7 + $0x28] sm:$0xff] }
 0x1ee   : > { %1698 = vmatpush2.msra.mxu1 %v2515_v32  ;;  %2711 = vmatprep.mubr.msk.f32.mxu0 %vm2983_vm9, %v2981_v5 }
 0x1ef   : > { %1700 = vmatmul.mubr.f32.vlgmr.msra.gmra.mxu1 %v1625_v34  ;;  %2714 = vmatprep.subr.mxu1 %v2981_v5 }
 0x1f0   : > { %2715 = vmatpush3.msk.msra.mxu1 %vm1214_vm3, %v1739_v37  ;;  %2746 = vmatprep.mubr.msk.f32.mxu1 %vm2983_vm9, %v2981_v5  ;;  %v2555_v37 = vld [vmem:[%s4211_s5 + $0x178] sm:$0x7f] }
 0x1f1   : > { %2716 = vmatprep.subr.mxu1 %v2981_v5  ;;  %2749 = vmatprep.subr.mxu0 %v2981_v5 }
 0x1f2   : > { %2717 = vmatpush3.msra.mxu1 %v1738_v39  ;;  %v2573_v39 = vld [vmem:[%s4211_s5 + $0x1f8] sm:$0x7f] }
 0x1f3   : > { %2718 = vmatprep.subr.mxu1 %v2981_v5 }
 0x1f4   : > { %2719 = vmatpush3.msra.mxu1 %v1737_v40  ;;  %v2572_v40 = vld [vmem:[%s4211_s5 + $0x1f0] sm:$0xff] }
 0x1f5   : > { %2720 = vmatprep.subr.mxu1 %v2981_v5 }
 0x1f6   : > { %2721 = vmatpush3.msra.mxu1 %v1736_v42  ;;  %v2571_v42 = vld [vmem:[%s4211_s5 + $0x1e8] sm:$0xff] }
 0x1f7   : > { %2722 = vmatprep.subr.mxu1 %v2981_v5 }
 0x1f8   : > { %2723 = vmatpush3.msra.mxu1 %v1735_v43  ;;  %v2570_v43 = vld [vmem:[%s4211_s5 + $0x1e0] sm:$0xff] }
 0x1f9   : > { %2724 = vmatprep.subr.mxu1 %v2981_v5 }
 0x1fa   : > { %2725 = vmatpush3.msra.mxu1 %v1734_v46  ;;  %v2569_v46 = vld [vmem:[%s4211_s5 + $0x1d8] sm:$0xff] }
 0x1fb   : > { %2726 = vmatprep.subr.mxu1 %v2981_v5 }
 0x1fc   : > { %2727 = vmatpush3.msra.mxu1 %v1733_v48  ;;  %v2568_v48 = vld [vmem:[%s4211_s5 + $0x1d0] sm:$0xff] }
 0x1fd   : > { %2728 = vmatprep.subr.mxu1 %v2981_v5 }
 0x1fe   : > { %2729 = vmatpush3.msra.mxu1 %v1732_v50  ;;  %v2567_v50 = vld [vmem:[%s4211_s5 + $0x1c8] sm:$0xff] }
 0x1ff   : > { %2730 = vmatprep.subr.mxu1 %v2981_v5 }
 0x200   : > { %2731 = vmatpush3.msra.mxu1 %v1731_v51  ;;  %v2566_v51 = vld [vmem:[%s4211_s5 + $0x1c0] sm:$0xff] }
 0x201   : > { %2732 = vmatprep.subr.mxu1 %v2981_v5 }
 0x202   : > { %2733 = vmatpush3.msra.mxu1 %v1730_v54  ;;  %v2565_v54 = vld [vmem:[%s4211_s5 + $0x1b8] sm:$0xff] }
 0x203   : > { %2734 = vmatprep.subr.mxu1 %v2981_v5 }
 0x204   : > { %2735 = vmatpush3.msra.mxu1 %v1729_v56  ;;  %v2564_v56 = vld [vmem:[%s4211_s5 + $0x1b0] sm:$0xff] }
 0x205   : > { %2736 = vmatprep.subr.mxu1 %v2981_v5 }
 0x206   : > { %2737 = vmatpush3.msra.mxu1 %v1728_v58  ;;  %v2563_v58 = vld [vmem:[%s4211_s5 + $0x1a8] sm:$0xff] }
 0x207   : > { %2738 = vmatprep.subr.mxu1 %v2981_v5 }
 0x208   : > { %2739 = vmatpush3.msra.mxu1 %v1727_v59  ;;  %v2562_v59 = vld [vmem:[%s4211_s5 + $0x1a0] sm:$0xff] }
 0x209   : > { %2740 = vmatprep.subr.mxu1 %v2981_v5 }
 0x20a   : > { %2741 = vmatpush3.msra.mxu1 %v1726_v61  ;;  %v2561_v61 = vld [vmem:[%s4211_s5 + $0x198] sm:$0xff] }
 0x20b   : > { %2742 = vmatprep.subr.mxu1 %v2981_v5 }
 0x20c   : > { %2743 = vmatpush3.msra.mxu1 %v1725_v53  ;;  %v2560_v53 = vld [vmem:[%s4211_s5 + $0x190] sm:$0xff] }
 0x20d   : > { %2744 = vmatprep.subr.mxu1 %v2981_v5 }
 0x20e   : > { %2745 = vmatpush3.msra.mxu1 %v1724_v18  ;;  %v2128_v18 = vld [vmem:[%s4213_s7 + $0x20] sm:$0xff] }
 0x20f   : > { %2784 = vmatprep.subr.mxu1 %v2981_v5 }
 0x266   : > { %v1294_v1 = vpop.f32.mrf.mxu1  ;;  %v1370_v2 = vpop.f32.mrf.mxu0 }
 0x267   : > { %v1371_v55 = vadd.f32 %v1370_v2, %v1294_v1  ;;  %v2541_v1 = vld [vmem:[%s4211_s5 + $0x108] sm:$0xff] }
 0x268   : > { %v1296_v3 = vpop.f32.mrf.mxu1  ;;  %v1372_v4 = vpop.f32.mrf.mxu0  ;;  %v2559_v2 = vld [vmem:[%s4211_s5 + $0x188] sm:$0xff] }
 0x269   : > { %v2540_v3 = vld [vmem:[%s4211_s5 + $0x100] sm:$0xff] }
 0x28a   : > { %v1480_v6 = vpop.f32.mrf.mxu1 }
 0x28b   : > { %v1484_v0 = vadd.f32 %v1480_v6, %v1371_v55  ;;  %v2558_v6 = vld [vmem:[%s4211_s5 + $0x180] sm:$0xff] }
 0x28c   : > { %v1591_v7 = vpop.f32.mrf.mxu0  ;;  %v1482_v8 = vpop.f32.mrf.mxu1 }
 0x28d   : > { %v1595_v9 = vadd.f32 %v1591_v7, %v1484_v0  ;;  %v2137_v0 = vld [vmem:[%s4213_s7 + $0x68] sm:$0xff] }
 0x28e   : > { %v1593_v62 = vpop.f32.mrf.mxu0 }
 0x28f   : > { %v2138_v62 = vld [vmem:[%s4213_s7 + $0x70] sm:$0xff] }
 0x2af   : > { %v1701_v10 = vpop.f32.mrf.mxu1 }
 0x2b0   : > { %v1705_v12 = vadd.f32 %v1701_v10, %v1595_v9  ;;  %v2136_v9 = vld [vmem:[%s4213_s7 + $0x60] sm:$0xff]  ;;  %v2135_v10 = vld [vmem:[%s4213_s7 + $0x58] sm:$0xff] }
 0x2b1   : > { %v1703_v14 = vpop.f32.mrf.mxu1 }
 0x2b2   : > { %v1713_v15 = vadd.f32 %v2519_v11, %v1705_v12  ;;  %v2134_v11 = vld [vmem:[%s4213_s7 + $0x50] sm:$0xff]  ;;  %v2133_v12 = vld [vmem:[%s4213_s7 + $0x48] sm:$0xff]  ;;  %v2132_v14 = vld [vmem:[%s4213_s7 + $0x40] sm:$0xff] }
 0x2b4   : > { %v1714_v16 = vmax.f32 %v1713_v15, 0.0  ;;  %v2131_v15 = vld [vmem:[%s4213_s7 + $0x38] sm:$0xff] }
 0x2b6   : > { %1715 = vst [vmem:[#allocation4] sm:$0xff] %v1714_v16  ;;  %v2130_v16 = vld [vmem:[%s4213_s7 + $0x30] sm:$0xff] }
 0x2bd   : > { %v1740_v19 = vld [vmem:[#allocation4 + $0x2] sm:$0x1]  ;;  %v1741_v20 = vld [vmem:[#allocation4 + $0x3] sm:$0x1]  ;;  %v1716_v22 = vld [vmem:[#allocation4] sm:$0x1] }
 0x2be   : > { %v1742_v23 = vmax.f32 %v1740_v19, %v1741_v20  ;;  %v1717_v25 = vld [vmem:[#allocation4 + $0x1] sm:$0x1]  ;;  %v1917_v27 = vld [vmem:[#allocation4 + $0x4] sm:$0x1]  ;;  %v1918_v28 = vld [vmem:[#allocation4 + $0x5] sm:$0x1] }
 0x2bf   : > { %v1718_v26 = vmax.f32 %v1716_v22, %v1717_v25  ;;  %v2019_v13 = vld [vmem:[#allocation4 + $0x6] sm:$0x1]  ;;  %v2020_v31 = vld [vmem:[#allocation4 + $0x7] sm:$0x1]  ;;  %v3902_v21 = vmax.f32 %v1917_v27, %v1918_v28  ;;  %v2127_v19 = vld [vmem:[%s4213_s7 + $0x18] sm:$0xff] }
 0x2c0   : > { %1744 = vrot.lane.b32.xlu0 %v1742_v23, %s2982_s14  ;;  %v3904_v32 = vmax.f32 %v2019_v13, %v2020_v31  ;;  %v2126_v20 = vld [vmem:[%s4213_s7 + $0x10] sm:$0xff]  ;;  %v2125_v22 = vld [vmem:[%s4213_s7 + $0x8] sm:$0xff]  ;;  %v2223_v27 = vld [vmem:[%s4215_s9 + $0x40] sm:$0xff] }
 0x2c1   : > { %1720 = vrot.lane.b32.xlu1 %v1718_v26, %s2982_s14  ;;  %v2225_v25 = vld [vmem:[%s4215_s9 + $0x50] sm:$0xf]  ;;  %v2222_v28 = vld [vmem:[%s4215_s9 + $0x38] sm:$0xff]  ;;  %v2220_v31 = vld [vmem:[%s4215_s9 + $0x28] sm:$0xff] }
 0x2c2   : > { %v2221_v13 = vld [vmem:[%s4215_s9 + $0x30] sm:$0xff] }
 0x2c4   : > { %1921 = vrot.lane.b32.xlu0 %v3902_v21, %s2982_s14 }
 0x2c5   : > { %2023 = vrot.lane.b32.xlu1 %v3904_v32, %s2982_s14 }
 0x332   : > { %v1745_v33 = vpop.permute.xlu0 %1744 }
 0x333   : > { %v1747_v34 = vmax.f32 %v1742_v23, %v1745_v33  ;;  %v1721_v24 = vpop.permute.xlu1 %1720  ;;  %v2124_v23 = vld [vmem:[%s4213_s7] sm:$0xff] }
 0x334   : > { %v1723_v38 = vmax.f32 %v1718_v26, %v1721_v24  ;;  %v2224_v26 = vld [vmem:[%s4215_s9 + $0x48] sm:$0xff] }
 0x335   : > { %2712 = vmatmul.mubr.msk.f32.vlgmr.msra.gmra.mxu0 %vm992_vm4, %v1747_v34 }
 0x336   : > { %2747 = vmatmul.mubr.msk.f32.vlgmr.msra.gmra.mxu1 %vm992_vm4, %v1723_v38  ;;  %2750 = vmatpush3.msk.msra.mxu0 %vm1214_vm3, %v2555_v37  ;;  %v1922_v55 = vpop.permute.xlu0 %1921 }
 0x337   : > { %2785 = vmatpush3.msk.msra.mxu1 %vm1214_vm3, %v2573_v39  ;;  %2751 = vmatprep.subr.mxu0 %v2981_v5  ;;  %v2024_v4 = vpop.permute.xlu1 %2023  ;;  %v1924_v7 = vmax.f32 %v3902_v21, %v1922_v55  ;;  %v2219_v21 = vld [vmem:[%s4215_s9 + $0x20] sm:$0xff] }
 0x338   : > { %2786 = vmatprep.subr.mxu1 %v2981_v5  ;;  %2752 = vmatpush3.msra.mxu0 %v2554_v29  ;;  %v2026_v8 = vmax.f32 %v3904_v32, %v2024_v4  ;;  %v2218_v32 = vld [vmem:[%s4215_s9 + $0x18] sm:$0xff] }
 0x339   : > { %2787 = vmatpush3.msra.mxu1 %v2572_v40  ;;  %2753 = vmatprep.subr.mxu0 %v2981_v5 }
 0x33a   : > { %2788 = vmatprep.subr.mxu1 %v2981_v5  ;;  %2754 = vmatpush3.msra.mxu0 %v2553_v41  ;;  %v2121_v41 = vld [vmem:[%s4212_s6] sm:$0x1] }
 0x33b   : > { %2789 = vmatpush3.msra.mxu1 %v2571_v42  ;;  %2755 = vmatprep.subr.mxu0 %v2981_v5 }
 0x33c   : > { %2790 = vmatprep.subr.mxu1 %v2981_v5  ;;  %2756 = vmatpush3.msra.mxu0 %v2552_v30 }
 0x33d   : > { %2791 = vmatpush3.msra.mxu1 %v2570_v43  ;;  %2757 = vmatprep.subr.mxu0 %v2981_v5 }
 0x33e   : > { %2792 = vmatprep.subr.mxu1 %v2981_v5  ;;  %2758 = vmatpush3.msra.mxu0 %v2551_v45 }
 0x33f   : > { %2793 = vmatpush3.msra.mxu1 %v2569_v46  ;;  %2759 = vmatprep.subr.mxu0 %v2981_v5 }
 0x340   : > { %2794 = vmatprep.subr.mxu1 %v2981_v5  ;;  %2760 = vmatpush3.msra.mxu0 %v2550_v35  ;;  %v2217_v35 = vld [vmem:[%s4215_s9 + $0x10] sm:$0xff] }
 0x341   : > { %2795 = vmatpush3.msra.mxu1 %v2568_v48  ;;  %2761 = vmatprep.subr.mxu0 %v2981_v5  ;;  %v2216_v48 = vld [vmem:[%s4215_s9 + $0x8] sm:$0xff] }
 0x342   : > { %2796 = vmatprep.subr.mxu1 %v2981_v5  ;;  %2762 = vmatpush3.msra.mxu0 %v2549_v49  ;;  %v2215_v49 = vld [vmem:[%s4215_s9] sm:$0xff] }
 0x343   : > { %2797 = vmatpush3.msra.mxu1 %v2567_v50  ;;  %2763 = vmatprep.subr.mxu0 %v2981_v5  ;;  %v2139_v50 = vld [vmem:[%s4214_s8] sm:$0x1] }
 0x344   : > { %2798 = vmatprep.subr.mxu1 %v2981_v5  ;;  %2764 = vmatpush3.msra.mxu0 %v2548_v36 }
 0x345   : > { %2799 = vmatpush3.msra.mxu1 %v2566_v51  ;;  %2765 = vmatprep.subr.mxu0 %v2981_v5 }
 0x346   : > { %2800 = vmatprep.subr.mxu1 %v2981_v5  ;;  %2766 = vmatpush3.msra.mxu0 %v2547_v52 }
 0x347   : > { %2801 = vmatpush3.msra.mxu1 %v2565_v54  ;;  %2767 = vmatprep.subr.mxu0 %v2981_v5 }
 0x348   : > { %2802 = vmatprep.subr.mxu1 %v2981_v5  ;;  %2768 = vmatpush3.msra.mxu0 %v2546_v44  ;;  %v2226_v44 = vld [vmem:[%s4216_s10] sm:$0x1] }
 0x349   : > { %2803 = vmatpush3.msra.mxu1 %v2564_v56  ;;  %2769 = vmatprep.subr.mxu0 %v2981_v5 }
 0x34a   : > { %2804 = vmatprep.subr.mxu1 %v2981_v5  ;;  %2770 = vmatpush3.msra.mxu0 %v2545_v57 }
 0x34b   : > { %2805 = vmatpush3.msra.mxu1 %v2563_v58  ;;  %2771 = vmatprep.subr.mxu0 %v2981_v5 }
 0x34c   : > { %2806 = vmatprep.subr.mxu1 %v2981_v5  ;;  %2772 = vmatpush3.msra.mxu0 %v2544_v47 }
 0x34d   : > { %2807 = vmatpush3.msra.mxu1 %v2562_v59  ;;  %2773 = vmatprep.subr.mxu0 %v2981_v5 }
 0x34e   : > { %2808 = vmatprep.subr.mxu1 %v2981_v5  ;;  %2774 = vmatpush3.msra.mxu0 %v2543_v60 }
 0x34f   : > { %2809 = vmatpush3.msra.mxu1 %v2561_v61  ;;  %2775 = vmatprep.subr.mxu0 %v2981_v5 }
 0x350   : > { %2810 = vmatprep.subr.mxu1 %v2981_v5  ;;  %2776 = vmatpush3.msra.mxu0 %v2542_v63 }
 0x351   : > { %2811 = vmatpush3.msra.mxu1 %v2560_v53  ;;  %2777 = vmatprep.subr.mxu0 %v2981_v5 }
 0x352   : > { %2812 = vmatprep.subr.mxu1 %v2981_v5  ;;  %2778 = vmatpush3.msra.mxu0 %v2541_v1 }
 0x353   : > { %2813 = vmatpush3.msra.mxu1 %v2559_v2  ;;  %2779 = vmatprep.subr.mxu0 %v2981_v5 }
 0x354   : > { %2814 = vmatprep.subr.mxu1 %v2981_v5  ;;  %2780 = vmatpush3.msra.mxu0 %v2540_v3 }
 0x355   : > { %2781 = vmatprep.mubr.msk.f32.mxu0 %vm2983_vm9, %v2981_v5  ;;  %2815 = vmatpush3.msra.mxu1 %v2558_v6 }
 0x356   : > { %2816 = vmatprep.mubr.msk.f32.mxu1 %vm2983_vm9, %v2981_v5  ;;  %2782 = vmatmul.mubr.msk.f32.vlgmr.msra.gmra.mxu0 %vm992_vm4, %v1924_v7 }
 0x357   : > { %2817 = vmatmul.mubr.msk.f32.vlgmr.msra.gmra.mxu1 %vm992_vm4, %v2026_v8  ;;  %2819 = vmatprep.subr.mxu0 %v2981_v5 }
 0x358   : > { %2849 = vmatprep.mubr.msk.f32.mxu0 %vm2983_vm9, %v2981_v5  ;;  %2852 = vmatprep.subr.mxu1 %v2981_v5 }
 0x359   : > { %2874 = vmatprep.mubr.msk.f32.mxu1 %vm2983_vm9, %v2981_v5  ;;  %2820 = vmatpush3.msra.mxu0 %v2138_v62 }
 0x35a   : > { %2821 = vmatprep.subr.mxu0 %v2981_v5  ;;  %2853 = vmatpush3.msk.msra.mxu1 %vm417_vm0, %v2225_v25 }
 0x35b   : > { %2822 = vmatpush3.msra.mxu0 %v2137_v0  ;;  %2854 = vmatprep.subr.mxu1 %v2981_v5 }
 0x35c   : > { %2823 = vmatprep.subr.mxu0 %v2981_v5  ;;  %2855 = vmatpush3.msra.mxu1 %v2224_v26 }
 0x35d   : > { %2824 = vmatpush3.msra.mxu0 %v2136_v9  ;;  %2856 = vmatprep.subr.mxu1 %v2981_v5 }
 0x35e   : > { %2825 = vmatprep.subr.mxu0 %v2981_v5  ;;  %2857 = vmatpush3.msra.mxu1 %v2223_v27 }
 0x35f   : > { %2826 = vmatpush3.msra.mxu0 %v2135_v10  ;;  %2858 = vmatprep.subr.mxu1 %v2981_v5 }
 0x360   : > { %2827 = vmatprep.subr.mxu0 %v2981_v5  ;;  %2859 = vmatpush3.msra.mxu1 %v2222_v28 }
 0x361   : > { %2828 = vmatpush3.msra.mxu0 %v2134_v11  ;;  %2860 = vmatprep.subr.mxu1 %v2981_v5 }
 0x362   : > { %2829 = vmatprep.subr.mxu0 %v2981_v5  ;;  %2861 = vmatpush3.msra.mxu1 %v2221_v13 }
 0x363   : > { %2830 = vmatpush3.msra.mxu0 %v2133_v12  ;;  %2862 = vmatprep.subr.mxu1 %v2981_v5 }
 0x364   : > { %2831 = vmatprep.subr.mxu0 %v2981_v5  ;;  %2863 = vmatpush3.msra.mxu1 %v2220_v31 }
 0x365   : > { %2832 = vmatpush3.msra.mxu0 %v2132_v14  ;;  %2864 = vmatprep.subr.mxu1 %v2981_v5 }
 0x366   : > { %2833 = vmatprep.subr.mxu0 %v2981_v5  ;;  %2865 = vmatpush3.msra.mxu1 %v2219_v21 }
 0x367   : > { %2834 = vmatpush3.msra.mxu0 %v2131_v15  ;;  %2866 = vmatprep.subr.mxu1 %v2981_v5 }
 0x368   : > { %2835 = vmatprep.subr.mxu0 %v2981_v5  ;;  %2867 = vmatpush3.msra.mxu1 %v2218_v32 }
 0x369   : > { %2836 = vmatpush3.msra.mxu0 %v2130_v16  ;;  %2868 = vmatprep.subr.mxu1 %v2981_v5 }
 0x36a   : > { %2837 = vmatprep.subr.mxu0 %v2981_v5  ;;  %2869 = vmatpush3.msra.mxu1 %v2217_v35 }
 0x36b   : > { %2838 = vmatpush3.msra.mxu0 %v2129_v17  ;;  %2870 = vmatprep.subr.mxu1 %v2981_v5 }
 0x36c   : > { %2839 = vmatprep.subr.mxu0 %v2981_v5  ;;  %2871 = vmatpush3.msra.mxu1 %v2216_v48 }
 0x36d   : > { %2840 = vmatpush3.msra.mxu0 %v2128_v18  ;;  %2872 = vmatprep.subr.mxu1 %v2981_v5 }
 0x36e   : > { %2841 = vmatprep.subr.mxu0 %v2981_v5  ;;  %2873 = vmatpush3.msra.mxu1 %v2215_v49 }
 0x36f   : > { %2842 = vmatpush3.msra.mxu0 %v2127_v19 }
 0x370   : > { %2843 = vmatprep.subr.mxu0 %v2981_v5 }
 0x371   : > { %2844 = vmatpush3.msra.mxu0 %v2126_v20 }
 0x372   : > { %2845 = vmatprep.subr.mxu0 %v2981_v5 }
 0x373   : > { %2846 = vmatpush3.msra.mxu0 %v2125_v22 }
 0x374   : > { %2847 = vmatprep.subr.mxu0 %v2981_v5 }
 0x375   : > { %2848 = vmatpush3.msra.mxu0 %v2124_v23 }
 0x3f5   : > { %v1837_v33 = vpop.f32.mrf.mxu0 }
 0x3f6   : > { %v1913_v34 = vpop.f32.mrf.mxu1 }
 0x3f7   : > { %v2713_v24 = vpop.f32.mrf.mxu0  ;;  %v1914_v38 = vadd.f32 %v1913_v34, %v1837_v33 }
 0x3f8   : > { %v2748_v37 = vpop.f32.mrf.mxu1 }
 0x416   : > { %v2014_v39 = vpop.f32.mrf.mxu0 }
 0x417   : > { %v2018_v29 = vadd.f32 %v2014_v39, %v1914_v38  ;;  %v2116_v40 = vpop.f32.mrf.mxu1 }
 0x418   : > { %v2783_v42 = vpop.f32.mrf.mxu0 }
 0x419   : > { %v2120_v30 = vadd.f32 %v2116_v40, %v2018_v29  ;;  %v2818_v43 = vpop.f32.mrf.mxu1 }
 0x41b   : > { %v2122_v45 = vadd.f32 %v2121_v41, %v2120_v30 }
 0x41d   : > { %v2123_v46 = vmax.f32 %v2122_v45, 0.0 }
 0x41f   : > { %2850 = vmatmul.mubr.msk.f32.vlgmr.msra.gmra.mxu0 %vm2140_vm10, %v2123_v46 }
 0x4df   : > { %v2210_v36 = vpop.f32.mrf.mxu0 }
 0x4e0   : > { %v2211_v51 = vadd.f32 %v2210_v36, %v2139_v50 }
 0x4e1   : > { %v2851_v52 = vpop.f32.mrf.mxu0 }
 0x4e2   : > { %v2214_v54 = vmax.f32 %v2211_v51, 0.0 }
 0x4e4   : > { %2875 = vmatmul.mubr.msk.f32.vlgmr.msra.gmra.mxu1 %vm2227_vm11, %v2214_v54 }
 0x5a4   : > { %v2300_v5 = vpop.f32.mrf.mxu1 }
 0x5a5   : > { %v2301_v56 = vadd.f32 %v2300_v5, %v2226_v44 }
 0x5a6   : > { %v2876_v57 = vpop.f32.mrf.mxu1 }
 0x5a7   : > { %2305 = vst.msk [vmem:[%s378_s13] sm:$0x1] %vm2304_vm12, %v2301_v56 }
 0x5a8   : > { %2932 = shalt.err (!%p2929_p3)
}
 0x5a9   : > { %s2933_s29 = scalar_lea.hbm %s4171_s16, 16  ;;  %s2937_s15 = scalar_lea.hbm %s4217_s11, 32 }
 0x5aa   : > { %p2934_p4 = scmp.ne.s32.totalorder %s4171_s16, %s2933_s29  ;;  %p2938_p9 = scmp.lt.s32.totalorder %s4171_s16, %s4217_s11 }
 0x5ab   : > { %p2939_p10 = scmp.lt.s32.totalorder %s2937_s15, %s2933_s29 }
 0x5ac   : > { %p2935_p7 = pnand %p2934_p4, %p3083_p5 }
 0x5ad   : > { %p2940_p11 = por %p2939_p10, %p2938_p9 }
 0x5ae   : > { %p2936_p8 = pneg %p2935_p7 }
 0x5b0   : > { %p2941_p12 = pnand %p2940_p11, %p2936_p8 }
 0x5b2   : > { %2944 = shalt.err (!%p2941_p12)
}
 0x5b3   : > { %2877 = dma.vmem_to_hbm [thread:$0]  (%p3083_p5), %s2320_s12, 16, %s4171_s16, %s2307_s22  }
 0x5b4 PF: > { %p2883_p13 = scmp.ge.s32.totalorder %s2979_s20, 2  ;;  %s2331_s26 = sand.u32 1, %s2967_s17  }
 0x5b5   : > { %s2332_s25 = scalar_lea.sflag [#allocation6], %s2331_s26 }
 0x5b6   : > { %p2880_p0 = pnand %p2883_p13, %p3087_p6 }
 0x5b8   : > { %p2881_p1 = pneg %p2880_p0 }
 0x5ba   : > { %2962 = dma.done.wait (%p2881_p1), %s2332_s25, 16  }
 0x5bb   : > { %2964 = vsyncadd (%p2881_p1), %s2332_s25, 4294967280  ;;  %s4223_s30 = sld [smem:[#allocation8_spill]]  ;;  %p21_p2 = scmp.ge.s32.totalorder %s3070_s23, 4  }
 0x5bc   : > { %s4224_s17 = smov %s2971_s18  ;;  %s4225_s18 = smov %s2975_s19 }
 0x5bd   : > { %s4227_s20 = smov %s3070_s23  ;;  %23 = sbr.rel (!%p21_p2) target bundleno = 3 (0x3), region = 144 }
 0x5c1   : > { %s4226_s19 = smov %s4223_s30 }
 0x5c2   :  { %2336 = vsyncpa [#allocation6], 1 }
 0x5c3   :  { %2338 = vsyncpa [#allocation6 + $0x1], 1 }

</bundles_post_ra>
